<compile_context>
chip_gen: v7x
topology: tpu7x:2x2x1
jax: 0.10.0
libtpu: 0.0.40
codegen_flags: <defaults>
</compile_context>

<pallas_src>
import functools
import math

import jax
import jax.numpy as jnp
from jax.experimental import pallas as pl
from jax.experimental.pallas import tpu as pltpu

KERNEL_SIZE_LAYER = [7, 7]
NUM_CLASSES = 8
BN_EPS = 1e-5
LANE = 128

_COMPILER_PARAMS = pltpu.CompilerParams(dimension_semantics=("arbitrary",))


def calc_image_size_after_conv_block(input_size, kernel_size=3, stride=1, padding=1):
    conv_size = (input_size - kernel_size + 2 * padding) // stride + 1
    return math.ceil((conv_size - 2) / 2) + 1


def _round_up(x, m):
    return ((x + m - 1) // m) * m


# ----------------------------- Pallas kernel --------------------------------

def _vconv_bn_relu_kernel(w_ref, p_ref, gb_ref, o_ref, *, m_true):
    """Fused VConv2d (all branches as one GEMM) + training-mode BatchNorm + ReLU.

    w_ref : (Cout, K)    bf16 - wfm-scaled, branch-concatenated conv weights
    p_ref : (K, Mpad)    bf16 - branch-concatenated im2col patches; columns
                                [m_true:Mpad) are zero padding
    gb_ref: (Cout, 2)    f32  - column 0 = BN gamma, column 1 = BN beta
    o_ref : (Cout, Mpad) bf16 - lane-dense output (M on the 128-lane axis)
    """
    z = jnp.dot(w_ref[...], p_ref[...], preferred_element_type=jnp.float32)
    # Batch statistics over the M = N*Ho*Wo axis (training-mode BN, as in the
    # previous accepted version).  Padded columns of z are exactly zero, so
    # plain sums divided by the true M give the correct biased mean / variance.
    inv_m = 1.0 / m_true
    mean = jnp.sum(z, axis=-1, keepdims=True) * inv_m
    ex2 = jnp.sum(z * z, axis=-1, keepdims=True) * inv_m
    var = jnp.maximum(ex2 - mean * mean, 0.0)
    gamma = gb_ref[:, 0:1]
    beta = gb_ref[:, 1:2]
    y = (z - mean) * jax.lax.rsqrt(var + BN_EPS) * gamma + beta
    o_ref[...] = jnp.maximum(y, 0.0).astype(o_ref.dtype)


def pallas_vconv_bn_relu(wT, patches, gb, m_true):
    Cout, K = wT.shape
    _, Mpad = patches.shape
    kernel = functools.partial(_vconv_bn_relu_kernel, m_true=float(m_true))
    return pl.pallas_call(
        kernel,
        out_shape=jax.ShapeDtypeStruct((Cout, Mpad), jnp.bfloat16),
        grid=(1,),
        in_specs=[pl.BlockSpec((Cout, K), lambda i: (0, 0)),
                  pl.BlockSpec((K, Mpad), lambda i: (0, 0)),
                  pl.BlockSpec((Cout, 2), lambda i: (0, 0))],
        out_specs=pl.BlockSpec((Cout, Mpad), lambda i: (0, 0)),
        compiler_params=_COMPILER_PARAMS,
    )(wT, patches, gb)


# ------------------------------ JAX glue ------------------------------------

def _im2col_cnhw(x, k):
    # x: (C, N, H, W), already spatially padded; stride 1, dilation 1.
    # Returns (C*k*k, N*Ho*Wo): rows ordered (c, ky, kx), columns (n, y, x).
    # Pure slice + stack + contiguous reshape -- no materialised transpose.
    C, N, H, W = x.shape
    Ho, Wo = H - k + 1, W - k + 1
    slices = [x[:, :, dy:dy + Ho, dx:dx + Wo]
              for dy in range(k) for dx in range(k)]
    p = jnp.stack(slices, axis=1)                       # (C, k*k, N, Ho, Wo)
    return p.reshape(C * k * k, N * Ho * Wo), Ho, Wo


def vconv2d_as_gemm_cnhw(x, weight, wfm, padding=1):
    # Reproduces VConv2d.forward for delta=0, g=2 (defaults): s_num branches with
    # centre-cropped kernels (7,5,3,1) and the exact per-branch padding / input
    # cropping of the reference, combined with the re-normalised weightFeatureMap
    # and folded into one GEMM by concatenating im2col matrices along K.
    Cout, Cin, K, _ = weight.shape
    s_num = int(math.ceil(K / 2))
    wfm_n = wfm / jnp.sum(wfm)          # in-place renormalisation each forward
    C, N, H, W = x.shape
    cols, wrows = [], []
    Ho = Wo = None
    for s in range(s_num):
        k = K - 2 * s
        if padding - s < 0:
            x1 = x[:, :, s:H - s, s:W - s]
            pad = 1
        else:
            x1 = x
            pad = padding - s
        x1p = jnp.pad(x1, ((0, 0), (0, 0), (pad, pad), (pad, pad)))
        p, ho, wo = _im2col_cnhw(x1p, k)
        Ho, Wo = ho, wo
        w_s = weight[:, :, s:K - s, s:K - s].reshape(Cout, Cin * k * k) * wfm_n[s]
        cols.append(p)
        wrows.append(w_s)
    patches = jnp.concatenate(cols, axis=0)             # (K_tot, M)
    wT = jnp.concatenate(wrows, axis=1)                 # (Cout, K_tot)
    return patches, wT, Ho, Wo


def maxpool2d_ceil_cnhw(x, k=2, s=2):
    # PyTorch MaxPool2d(kernel_size=2, stride=2, ceil_mode=True), no padding,
    # applied to (C, N, H, W) activations.
    C, N, H, W = x.shape
    out_h = math.ceil((H - k) / s) + 1
    out_w = math.ceil((W - k) / s) + 1
    pad_h = max(0, (out_h - 1) * s + k - H)
    pad_w = max(0, (out_w - 1) * s + k - W)
    neg_inf = jnp.asarray(-jnp.inf, dtype=x.dtype)
    return jax.lax.reduce_window(
        x, neg_inf, jax.lax.max,
        window_dimensions=(1, 1, k, k), window_strides=(1, 1, s, s),
        padding=((0, 0), (0, 0), (0, pad_h), (0, pad_w)))


def _conv_block(x, blk):
    # x: (C, N, H, W) bf16 activations.
    patches, wT, Ho, Wo = vconv2d_as_gemm_cnhw(x, blk["w"], blk["wfm"], padding=1)
    Cout = wT.shape[0]
    N = x.shape[1]
    M = N * Ho * Wo
    Mpad = _round_up(M, LANE)                           # lane-aligned output
    patches = jnp.pad(patches.astype(jnp.bfloat16), ((0, 0), (0, Mpad - M)))
    wT = wT.astype(jnp.bfloat16)
    gb = jnp.stack([blk["gamma"], blk["beta"]], axis=-1).astype(jnp.float32)
    y = pallas_vconv_bn_relu(wT, patches, gb, M)        # (Cout, Mpad) bf16
    y = y[:, :M].reshape(Cout, N, Ho, Wo)               # back to (C, N, Ho, Wo)
    return maxpool2d_ceil_cnhw(y)


# ----------------------------- model ----------------------------------------

def init_params(key, in_channels=3, width=4, num_classes=NUM_CLASSES,
                input_image_size=32):
    keys = jax.random.split(key, len(KERNEL_SIZE_LAYER) + 1)
    params = {"blocks": []}
    cin = in_channels
    size = input_image_size
    for i, k in enumerate(KERNEL_SIZE_LAYER):
        fan_out = width * k * k
        std = math.sqrt(2.0 / fan_out)          # kaiming_normal_(fan_out, relu)
        w = std * jax.random.normal(keys[i], (width, cin, k, k), jnp.float32)
        s_num = int(math.ceil(k / 2))
        wfm = jnp.full((s_num,), 1.0 / s_num, jnp.float32)   # weightFeatureMap
        gamma = jnp.ones((width,), jnp.float32)              # BN weight -> 1
        beta = jnp.zeros((width,), jnp.float32)              # BN bias -> 0
        # Conv bias is zero-initialised in the reference and is in any case
        # cancelled exactly by the batch-statistics BatchNorm that follows, so
        # it is not carried into the kernel (perf-review item).
        params["blocks"].append(dict(w=w, wfm=wfm, gamma=gamma, beta=beta))
        cin = width
        size = calc_image_size_after_conv_block(size, kernel_size=k)
    in_features = size * size * width
    lw = 0.01 * jax.random.normal(keys[-1], (num_classes, in_features), jnp.float32)
    lb = jnp.zeros((num_classes,), jnp.float32)
    params["linear"] = dict(w=lw, b=lb)
    return params


def student_net6_forward(params, x):
    # x: (N, C, H, W) f32 (PyTorch layout).  One tiny transpose to (C, N, H, W)
    # + bf16 cast up front; activations then stay in that layout between blocks
    # (no per-block layout shuffles).
    x = jnp.transpose(x, (1, 0, 2, 3)).astype(jnp.bfloat16)
    for blk in params["blocks"]:
        x = _conv_block(x, blk)
    C, N, H, W = x.shape
    # Match torch's x.view(N, -1) on an NCHW tensor: per-sample (c, h, w) order.
    flat = jnp.transpose(x, (1, 0, 2, 3)).reshape(N, C * H * W).astype(jnp.float32)
    # Per perf review: a dedicated pallas_call for this (N,100)x(100,8) matmul is
    # pure launch/DMA overhead, so the classifier runs in plain JAX.
    return flat @ params["linear"]["w"].T + params["linear"]["b"]


if __name__ == "__main__":
    key = jax.random.PRNGKey(0)
    pkey, xkey = jax.random.split(key)
    params = init_params(pkey, in_channels=3, width=4,
                         num_classes=NUM_CLASSES, input_image_size=32)
    x = jax.random.normal(xkey, (2, 3, 32, 32), jnp.float32)

    fwd = jax.jit(student_net6_forward)
    out = jax.block_until_ready(fwd(params, x))
    assert out.shape == (2, NUM_CLASSES), out.shape
    assert bool(jnp.all(jnp.isfinite(out)))
    print("KERNEL_OK")
</pallas_src>

<mosaic_0001>
module attributes {stable_mosaic.version = 11 : i64} {
  func.func @_vconv_bn_relu_kernel(%arg0: i32, %arg1: memref<4x252xbf16, #tpu.memory_space<vmem>>, %arg2: memref<252x1664xbf16, #tpu.memory_space<vmem>>, %arg3: memref<4x2xf32, #tpu.memory_space<vmem>>, %arg4: memref<4x1664xbf16, #tpu.memory_space<vmem>>) attributes {dimension_semantics = [#tpu.dimension_semantics<arbitrary>], iteration_bounds = array<i64: 1>, scalar_prefetch = 0 : i64, scratch_operands = 0 : i64, tpu.core_type = #tpu.core_type<tc>, window_params = [{pipeline_mode = #tpu.pipeline_mode<synchronous>, transform_indices = @transform_0, window_bounds = array<i64: 4, 252>}, {pipeline_mode = #tpu.pipeline_mode<synchronous>, transform_indices = @transform_1, window_bounds = array<i64: 252, 1664>}, {pipeline_mode = #tpu.pipeline_mode<synchronous>, transform_indices = @transform_2, window_bounds = array<i64: 4, 2>}, {pipeline_mode = #tpu.pipeline_mode<synchronous>, transform_indices = @transform_3, window_bounds = array<i64: 4, 1664>}]} {
    %c0 = arith.constant 0 : index
    %c0_0 = arith.constant 0 : index
    %0 = vector.load %arg1[%c0, %c0_0] : memref<4x252xbf16, #tpu.memory_space<vmem>>, vector<4x252xbf16>
    %c0_1 = arith.constant 0 : index
    %c0_2 = arith.constant 0 : index
    %1 = vector.load %arg2[%c0_1, %c0_2] : memref<252x1664xbf16, #tpu.memory_space<vmem>>, vector<252x1664xbf16>
    %cst = arith.constant dense<0.000000e+00> : vector<4x1664xf32>
    %2 = tpu.matmul %0, %1, %cst {dimension_numbers = #tpu.dot_dimension_numbers<[1], [0], [0], [1], [0, 0, 1, 1], [], []>} : vector<4x252xbf16>, vector<252x1664xbf16>, vector<4x1664xf32> -> vector<4x1664xf32>
    %cst_3 = arith.constant dense<0.000000e+00> : vector<4xf32>
    %3 = vector.multi_reduction <add>, %2, %cst_3 [1] : vector<4x1664xf32> to vector<4xf32>
    %4 = vector.shape_cast %3 : vector<4xf32> to vector<4x1xf32>
    %cst_4 = arith.constant 6.37755089E-4 : f32
    %5 = vector.broadcast %cst_4 : f32 to vector<4x1xf32>
    %6 = arith.mulf %4, %5 : vector<4x1xf32>
    %7 = arith.mulf %2, %2 : vector<4x1664xf32>
    %cst_5 = arith.constant dense<0.000000e+00> : vector<4xf32>
    %8 = vector.multi_reduction <add>, %7, %cst_5 [1] : vector<4x1664xf32> to vector<4xf32>
    %9 = vector.shape_cast %8 : vector<4xf32> to vector<4x1xf32>
    %cst_6 = arith.constant 6.37755089E-4 : f32
    %10 = vector.broadcast %cst_6 : f32 to vector<4x1xf32>
    %11 = arith.mulf %9, %10 : vector<4x1xf32>
    %12 = arith.mulf %6, %6 : vector<4x1xf32>
    %13 = arith.subf %11, %12 : vector<4x1xf32>
    %cst_7 = arith.constant 0.000000e+00 : f32
    %14 = vector.broadcast %cst_7 : f32 to vector<4x1xf32>
    %15 = arith.maximumf %13, %14 : vector<4x1xf32>
    %c0_8 = arith.constant 0 : index
    %c0_9 = arith.constant 0 : index
    %16 = vector.load %arg3[%c0_8, %c0_9] : memref<4x2xf32, #tpu.memory_space<vmem>>, vector<4x1xf32>
    %c0_10 = arith.constant 0 : index
    %c1 = arith.constant 1 : index
    %17 = vector.load %arg3[%c0_10, %c1] : memref<4x2xf32, #tpu.memory_space<vmem>>, vector<4x1xf32>
    %18 = vector.broadcast %6 : vector<4x1xf32> to vector<4x1664xf32>
    %19 = arith.subf %2, %18 : vector<4x1664xf32>
    %cst_11 = arith.constant 9.99999974E-6 : f32
    %20 = vector.broadcast %cst_11 : f32 to vector<4x1xf32>
    %21 = arith.addf %15, %20 : vector<4x1xf32>
    %22 = math.rsqrt %21 : vector<4x1xf32>
    %23 = vector.broadcast %22 : vector<4x1xf32> to vector<4x1664xf32>
    %24 = arith.mulf %19, %23 : vector<4x1664xf32>
    %25 = vector.broadcast %16 : vector<4x1xf32> to vector<4x1664xf32>
    %26 = arith.mulf %24, %25 : vector<4x1664xf32>
    %27 = vector.broadcast %17 : vector<4x1xf32> to vector<4x1664xf32>
    %28 = arith.addf %26, %27 : vector<4x1664xf32>
    %cst_12 = arith.constant 0.000000e+00 : f32
    %29 = vector.broadcast %cst_12 : f32 to vector<4x1664xf32>
    %30 = arith.maximumf %28, %29 : vector<4x1664xf32>
    %31 = arith.truncf %30 : vector<4x1664xf32> to vector<4x1664xbf16>
    %c0_13 = arith.constant 0 : index
    %c0_14 = arith.constant 0 : index
    %32 = vector.load %arg4[%c0_13, %c0_14] : memref<4x1664xbf16, #tpu.memory_space<vmem>>, vector<4x1664xbf16>
    tpu.vector_store %arg4[%c0_13, %c0_14], %31 {strides = array<i32>} : memref<4x1664xbf16, #tpu.memory_space<vmem>>, vector<4x1664xbf16>,
    return
  }
  func.func @transform_0(%arg0: i32) -> (i32, i32) {
    %c0_i32 = arith.constant 0 : i32
    %c0_i32_0 = arith.constant 0 : i32
    %c0_i32_1 = arith.constant 0 : i32
    return %c0_i32, %c0_i32_0 : i32, i32
  }
  func.func @transform_1(%arg0: i32) -> (i32, i32) {
    %c0_i32 = arith.constant 0 : i32
    %c0_i32_0 = arith.constant 0 : i32
    %c0_i32_1 = arith.constant 0 : i32
    return %c0_i32, %c0_i32_0 : i32, i32
  }
  func.func @transform_2(%arg0: i32) -> (i32, i32) {
    %c0_i32 = arith.constant 0 : i32
    %c0_i32_0 = arith.constant 0 : i32
    %c0_i32_1 = arith.constant 0 : i32
    return %c0_i32, %c0_i32_0 : i32, i32
  }
  func.func @transform_3(%arg0: i32) -> (i32, i32) {
    %c0_i32 = arith.constant 0 : i32
    %c0_i32_0 = arith.constant 0 : i32
    %c0_i32_1 = arith.constant 0 : i32
    return %c0_i32, %c0_i32_0 : i32, i32
  }
}

module attributes {stable_mosaic.version = 11 : i64} {
  func.func @_vconv_bn_relu_kernel(%arg0: i32, %arg1: memref<4x336xbf16, #tpu.memory_space<vmem>>, %arg2: memref<336x256xbf16, #tpu.memory_space<vmem>>, %arg3: memref<4x2xf32, #tpu.memory_space<vmem>>, %arg4: memref<4x256xbf16, #tpu.memory_space<vmem>>) attributes {dimension_semantics = [#tpu.dimension_semantics<arbitrary>], iteration_bounds = array<i64: 1>, scalar_prefetch = 0 : i64, scratch_operands = 0 : i64, tpu.core_type = #tpu.core_type<tc>, window_params = [{pipeline_mode = #tpu.pipeline_mode<synchronous>, transform_indices = @transform_0, window_bounds = array<i64: 4, 336>}, {pipeline_mode = #tpu.pipeline_mode<synchronous>, transform_indices = @transform_1, window_bounds = array<i64: 336, 256>}, {pipeline_mode = #tpu.pipeline_mode<synchronous>, transform_indices = @transform_2, window_bounds = array<i64: 4, 2>}, {pipeline_mode = #tpu.pipeline_mode<synchronous>, transform_indices = @transform_3, window_bounds = array<i64: 4, 256>}]} {
    %c0 = arith.constant 0 : index
    %c0_0 = arith.constant 0 : index
    %0 = vector.load %arg1[%c0, %c0_0] : memref<4x336xbf16, #tpu.memory_space<vmem>>, vector<4x336xbf16>
    %c0_1 = arith.constant 0 : index
    %c0_2 = arith.constant 0 : index
    %1 = vector.load %arg2[%c0_1, %c0_2] : memref<336x256xbf16, #tpu.memory_space<vmem>>, vector<336x256xbf16>
    %cst = arith.constant dense<0.000000e+00> : vector<4x256xf32>
    %2 = tpu.matmul %0, %1, %cst {dimension_numbers = #tpu.dot_dimension_numbers<[1], [0], [0], [1], [0, 0, 1, 1], [], []>} : vector<4x336xbf16>, vector<336x256xbf16>, vector<4x256xf32> -> vector<4x256xf32>
    %cst_3 = arith.constant dense<0.000000e+00> : vector<4xf32>
    %3 = vector.multi_reduction <add>, %2, %cst_3 [1] : vector<4x256xf32> to vector<4xf32>
    %4 = vector.shape_cast %3 : vector<4xf32> to vector<4x1xf32>
    %cst_4 = arith.constant 5.000000e-03 : f32
    %5 = vector.broadcast %cst_4 : f32 to vector<4x1xf32>
    %6 = arith.mulf %4, %5 : vector<4x1xf32>
    %7 = arith.mulf %2, %2 : vector<4x256xf32>
    %cst_5 = arith.constant dense<0.000000e+00> : vector<4xf32>
    %8 = vector.multi_reduction <add>, %7, %cst_5 [1] : vector<4x256xf32> to vector<4xf32>
    %9 = vector.shape_cast %8 : vector<4xf32> to vector<4x1xf32>
    %cst_6 = arith.constant 5.000000e-03 : f32
    %10 = vector.broadcast %cst_6 : f32 to vector<4x1xf32>
    %11 = arith.mulf %9, %10 : vector<4x1xf32>
    %12 = arith.mulf %6, %6 : vector<4x1xf32>
    %13 = arith.subf %11, %12 : vector<4x1xf32>
    %cst_7 = arith.constant 0.000000e+00 : f32
    %14 = vector.broadcast %cst_7 : f32 to vector<4x1xf32>
    %15 = arith.maximumf %13, %14 : vector<4x1xf32>
    %c0_8 = arith.constant 0 : index
    %c0_9 = arith.constant 0 : index
    %16 = vector.load %arg3[%c0_8, %c0_9] : memref<4x2xf32, #tpu.memory_space<vmem>>, vector<4x1xf32>
    %c0_10 = arith.constant 0 : index
    %c1 = arith.constant 1 : index
    %17 = vector.load %arg3[%c0_10, %c1] : memref<4x2xf32, #tpu.memory_space<vmem>>, vector<4x1xf32>
    %18 = vector.broadcast %6 : vector<4x1xf32> to vector<4x256xf32>
    %19 = arith.subf %2, %18 : vector<4x256xf32>
    %cst_11 = arith.constant 9.99999974E-6 : f32
    %20 = vector.broadcast %cst_11 : f32 to vector<4x1xf32>
    %21 = arith.addf %15, %20 : vector<4x1xf32>
    %22 = math.rsqrt %21 : vector<4x1xf32>
    %23 = vector.broadcast %22 : vector<4x1xf32> to vector<4x256xf32>
    %24 = arith.mulf %19, %23 : vector<4x256xf32>
    %25 = vector.broadcast %16 : vector<4x1xf32> to vector<4x256xf32>
    %26 = arith.mulf %24, %25 : vector<4x256xf32>
    %27 = vector.broadcast %17 : vector<4x1xf32> to vector<4x256xf32>
    %28 = arith.addf %26, %27 : vector<4x256xf32>
    %cst_12 = arith.constant 0.000000e+00 : f32
    %29 = vector.broadcast %cst_12 : f32 to vector<4x256xf32>
    %30 = arith.maximumf %28, %29 : vector<4x256xf32>
    %31 = arith.truncf %30 : vector<4x256xf32> to vector<4x256xbf16>
    %c0_13 = arith.constant 0 : index
    %c0_14 = arith.constant 0 : index
    %32 = vector.load %arg4[%c0_13, %c0_14] : memref<4x256xbf16, #tpu.memory_space<vmem>>, vector<4x256xbf16>
    tpu.vector_store %arg4[%c0_13, %c0_14], %31 {strides = array<i32>} : memref<4x256xbf16, #tpu.memory_space<vmem>>, vector<4x256xbf16>,
    return
  }
  func.func @transform_0(%arg0: i32) -> (i32, i32) {
    %c0_i32 = arith.constant 0 : i32
    %c0_i32_0 = arith.constant 0 : i32
    %c0_i32_1 = arith.constant 0 : i32
    return %c0_i32, %c0_i32_0 : i32, i32
  }
  func.func @transform_1(%arg0: i32) -> (i32, i32) {
    %c0_i32 = arith.constant 0 : i32
    %c0_i32_0 = arith.constant 0 : i32
    %c0_i32_1 = arith.constant 0 : i32
    return %c0_i32, %c0_i32_0 : i32, i32
  }
  func.func @transform_2(%arg0: i32) -> (i32, i32) {
    %c0_i32 = arith.constant 0 : i32
    %c0_i32_0 = arith.constant 0 : i32
    %c0_i32_1 = arith.constant 0 : i32
    return %c0_i32, %c0_i32_0 : i32, i32
  }
  func.func @transform_3(%arg0: i32) -> (i32, i32) {
    %c0_i32 = arith.constant 0 : i32
    %c0_i32_0 = arith.constant 0 : i32
    %c0_i32_1 = arith.constant 0 : i32
    return %c0_i32, %c0_i32_0 : i32, i32
  }
}

</mosaic_0001>

<bundles_post_ra>
// kernel: student_net6_forward.2
= control target key start
LH: loop header
LB: loop body
LE: loop exit
PB: predicated region body
PF: predicated region fallthrough
CT: control target
= control target key end

     0   :  { %vm1293_vm0 = vcmask 1014784   ;;  %vm1297_vm1 = vcmask 1045504   ;;  %vm1623_vm2 = vcmask 1043456   ;;  %s3244_s1 = inlined_call_operand.vmem [shape: bf16[252,1664], index: 1, kind: input, shape index: {}]   ;;  %s3245_s0 = inlined_call_operand.vmem [shape: bf16[4,252], index: 0, kind: input, shape index: {}]   ;;  %s3246_s2 = inlined_call_operand.vmem [shape: f32[4,2], index: 2, kind: input, shape index: {}]   ;;  %s3247_s3 = inlined_call_operand.vmem [shape: bf16[4,1664], index: 3, kind: output, shape index: {}]  }
   0x1   :  { %v2127_v0 = vld [vmem:[%s3244_s1 + $0x4] ss:$52 sps:$4 sm:$0xff]   ;;  %v2129_v1 = vld [vmem:[%s3244_s1] ss:$52 sps:$4 sm:$0xff]   ;;  %v2134_v4 = vld [vmem:[%s3244_s1 + $0x8] ss:$52 sps:$4 sm:$0xff]  }
   0x2   :  { %1337 = vmatprep.subr.bf16.mxu0 %v2127_v0  ;;  %v2130_v2 = vld [vmem:[%s3244_s1 + $0xc] ss:$52 sps:$4 sm:$0xff]   ;;  %v2135_v5 = vld [vmem:[%s3244_s1 + $0x68] ss:$52 sps:$4 sm:$0xff]   ;;  %v2140_v8 = vld [vmem:[%s3244_s1 + $0x70] ss:$52 sps:$4 sm:$0xff]  }
   0x3   :  { %1338 = vmatpush1.bf16.msra.mxu0 %v2129_v1  ;;  %v2132_v3 = vld [vmem:[%s3244_s1 + $0x6c] ss:$52 sps:$4 sm:$0xff]   ;;  %1378 = vmatprep.subr.bf16.mxu1 %v2130_v2  ;;  %v2136_v6 = vld [vmem:[%s3244_s1 + $0x74] ss:$52 sps:$4 sm:$0xff]   ;;  %v2141_v9 = vld [vmem:[%s3244_s1 + $0xd0] ss:$52 sps:$4 sm:$0xff]  }
   0x4   :  { %1339 = vmatprep.subr.bf16.mxu0 %v2132_v3  ;;  %1379 = vmatpush1.bf16.msra.mxu1 %v2134_v4  ;;  %v2138_v7 = vld [vmem:[%s3244_s1 + $0xd4] ss:$52 sps:$4 sm:$0xff]   ;;  %v2142_v10 = vld [vmem:[%s3244_s1 + $0xdc] ss:$52 sps:$4 sm:$0xff]   ;;  %v2146_v12 = vld [vmem:[%s3244_s1 + $0xd8] ss:$52 sps:$4 sm:$0xff]  }
   0x5   :  { %1380 = vmatprep.subr.bf16.mxu1 %v2136_v6  ;;  %v2144_v11 = vld [vmem:[%s3244_s1 + $0x13c] ss:$52 sps:$4 sm:$0xff]   ;;  %v2148_v13 = vld [vmem:[%s3244_s1 + $0x144] ss:$52 sps:$4 sm:$0xff]   ;;  %v2152_v16 = vld [vmem:[%s3244_s1 + $0x140] ss:$52 sps:$4 sm:$0xff]  }
   0x6   :  { %v2147_v14 = vld [vmem:[%s3244_s1 + $0x138] ss:$52 sps:$4 sm:$0xff]   ;;  %v2153_v18 = vld [vmem:[%s3244_s1 + $0x1a0] ss:$52 sps:$4 sm:$0xff]   ;;  %v2158_v20 = vld [vmem:[%s3244_s1 + $0x1a8] ss:$52 sps:$4 sm:$0xff]  }
   0x7   :  { %1340 = vmatpush1.bf16.msra.mxu0 %v2135_v5  ;;  %v2150_v15 = vld [vmem:[%s3244_s1 + $0x1a4] ss:$52 sps:$4 sm:$0xff]   ;;  %v2154_v17 = vld [vmem:[%s3244_s1 + $0x1ac] ss:$52 sps:$4 sm:$0xff]   ;;  %v2160_v21 = vld [vmem:[%s3244_s1 + $0x214] ss:$52 sps:$4 sm:$0xff]  }
   0x8   :  { %1341 = vmatprep.subr.bf16.mxu0 %v2138_v7  ;;  %1381 = vmatpush1.bf16.msra.mxu1 %v2140_v8  ;;  %v2156_v19 = vld [vmem:[%s3244_s1 + $0x20c] ss:$52 sps:$4 sm:$0xff]   ;;  %v2159_v22 = vld [vmem:[%s3244_s1 + $0x208] ss:$52 sps:$4 sm:$0xff]   ;;  %v2164_v24 = vld [vmem:[%s3244_s1 + $0x210] ss:$52 sps:$4 sm:$0xff]  }
   0x9   :  { %1382 = vmatprep.subr.bf16.mxu1 %v2142_v10  ;;  %v2162_v23 = vld [vmem:[%s3244_s1 + $0x274] ss:$52 sps:$4 sm:$0xff]   ;;  %v2166_v25 = vld [vmem:[%s3244_s1 + $0x27c] ss:$52 sps:$4 sm:$0xff]   ;;  %v2170_v28 = vld [vmem:[%s3244_s1 + $0x278] ss:$52 sps:$4 sm:$0xff]  }
   0xa   :  { %v2165_v26 = vld [vmem:[%s3244_s1 + $0x270] ss:$52 sps:$4 sm:$0xff]   ;;  %v2171_v30 = vld [vmem:[%s3244_s1 + $0x2d8] ss:$52 sps:$4 sm:$0xff]   ;;  %v2176_v32 = vld [vmem:[%s3244_s1 + $0x2e0] ss:$52 sps:$4 sm:$0xff]  }
   0xb   :  { %1342 = vmatpush1.bf16.msra.mxu0 %v2141_v9  ;;  %v2168_v27 = vld [vmem:[%s3244_s1 + $0x2dc] ss:$52 sps:$4 sm:$0xff]   ;;  %v2172_v29 = vld [vmem:[%s3244_s1 + $0x2e4] ss:$52 sps:$4 sm:$0xff]   ;;  %v2178_v33 = vld [vmem:[%s3244_s1 + $0x34c] ss:$52 sps:$4 sm:$0xff]  }
   0xc   :  { %1343 = vmatprep.subr.bf16.mxu0 %v2144_v11  ;;  %1383 = vmatpush1.bf16.msra.mxu1 %v2146_v12  ;;  %v2174_v31 = vld [vmem:[%s3244_s1 + $0x344] ss:$52 sps:$4 sm:$0xff]   ;;  %v2177_v34 = vld [vmem:[%s3244_s1 + $0x340] ss:$52 sps:$4 sm:$0xff]   ;;  %v2182_v36 = vld [vmem:[%s3244_s1 + $0x348] ss:$52 sps:$4 sm:$0xff]  }
   0xd   :  { %1384 = vmatprep.subr.bf16.mxu1 %v2148_v13  ;;  %v2180_v35 = vld [vmem:[%s3244_s1 + $0x3ac] ss:$52 sps:$4 sm:$0xff]   ;;  %v2184_v37 = vld [vmem:[%s3244_s1 + $0x3b4] ss:$52 sps:$4 sm:$0xff]   ;;  %v2188_v40 = vld [vmem:[%s3244_s1 + $0x3b0] ss:$52 sps:$4 sm:$0xff]  }
   0xe   :  { %v2183_v38 = vld [vmem:[%s3244_s1 + $0x3a8] ss:$52 sps:$4 sm:$0xff]   ;;  %v2189_v42 = vld [vmem:[%s3244_s1 + $0x410] ss:$52 sps:$4 sm:$0xff]   ;;  %v2194_v44 = vld [vmem:[%s3244_s1 + $0x418] ss:$52 sps:$4 sm:$0xff]  }
   0xf   :  { %1344 = vmatpush1.bf16.msra.mxu0 %v2147_v14  ;;  %v2186_v39 = vld [vmem:[%s3244_s1 + $0x414] ss:$52 sps:$4 sm:$0xff]   ;;  %v2190_v41 = vld [vmem:[%s3244_s1 + $0x41c] ss:$52 sps:$4 sm:$0xff]   ;;  %v2196_v45 = vld [vmem:[%s3244_s1 + $0x484] ss:$52 sps:$4 sm:$0xff]  }
  0x10   :  { %1345 = vmatprep.subr.bf16.mxu0 %v2150_v15  ;;  %1385 = vmatpush1.bf16.msra.mxu1 %v2152_v16  ;;  %v2192_v43 = vld [vmem:[%s3244_s1 + $0x47c] ss:$52 sps:$4 sm:$0xff]   ;;  %v2597_v46 = vld.sshfl [vmem:[%s3245_s0] sm:$0x33 pattern:$0x76325410] }
  0x11   :  { %1386 = vmatprep.subr.bf16.mxu1 %v2154_v17  ;;  %v2195_v47 = vld [vmem:[%s3244_s1 + $0x478] ss:$52 sps:$4 sm:$0xff]   ;;  %v2604_v48 = vcombine.high %v2597_v46, %v2597_v46  ;;  %v2200_v50 = vld [vmem:[%s3244_s1 + $0x480] ss:$52 sps:$4 sm:$0xff]   ;;  %v2206_v54 = vld [vmem:[%s3244_s1 + $0x4e8] ss:$52 sps:$4 sm:$0xff]  }
  0x12   :  { %v2198_v49 = vld [vmem:[%s3244_s1 + $0x4e4] ss:$52 sps:$4 sm:$0xff]   ;;  %v2202_v51 = vld [vmem:[%s3244_s1 + $0x4ec] ss:$52 sps:$4 sm:$0xff]   ;;  %v2208_v55 = vld [vmem:[%s3244_s1 + $0x554] ss:$52 sps:$4 sm:$0xff]  }
  0x13   :  { %1346 = vmatpush1.bf16.msra.mxu0 %v2153_v18  ;;  %2079 = vmatprep.mubr.msk.bf16.mxu0 %vm1293_vm0, %v2604_v48  ;;  %v2201_v52 = vld [vmem:[%s3244_s1 + $0x4e0] ss:$52 sps:$4 sm:$0xff]   ;;  %v2207_v56 = vld [vmem:[%s3244_s1 + $0x548] ss:$52 sps:$4 sm:$0xff]   ;;  %v2212_v58 = vld [vmem:[%s3244_s1 + $0x550] ss:$52 sps:$4 sm:$0xff]  }
  0x14   :  { %1347 = vmatprep.subr.bf16.mxu0 %v2156_v19  ;;  %1387 = vmatpush1.bf16.msra.mxu1 %v2158_v20  ;;  %v2204_v53 = vld [vmem:[%s3244_s1 + $0x54c] ss:$52 sps:$4 sm:$0xff]   ;;  %v2210_v57 = vld [vmem:[%s3244_s1 + $0x5b4] ss:$52 sps:$4 sm:$0xff]   ;;  %v2213_v59 = vld [vmem:[%s3244_s1 + $0x5b0] ss:$52 sps:$4 sm:$0xff]  }
  0x15   :  { %1388 = vmatprep.subr.bf16.mxu1 %v2160_v21  ;;  %2081 = vmatprep.mubr.msk.bf16.mxu1 %vm1293_vm0, %v2604_v48  ;;  %v2214_v60 = vld [vmem:[%s3244_s1 + $0x5bc] ss:$52 sps:$4 sm:$0xff]   ;;  %v2219_v62 = vld [vmem:[%s3244_s1 + $0x618] ss:$52 sps:$4 sm:$0x3f]  }
  0x16   :  { %v2216_v61 = vld [vmem:[%s3244_s1 + $0x61c] ss:$52 sps:$4 sm:$0x3f]   ;;  %v2218_v63 = vld [vmem:[%s3244_s1 + $0x5b8] ss:$52 sps:$4 sm:$0xff]   ;;  %v1299_v2 = vsel %vm1297_vm1, %v2219_v62, 0 }
  0x17   :  { %1348 = vmatpush1.bf16.msra.mxu0 %v2159_v22  ;;  %v2220_v0 = vld [vmem:[%s3244_s1 + $0x624] ss:$52 sps:$4 sm:$0x3f]   ;;  %v2222_v1 = vld [vmem:[%s3244_s1 + $0x620] ss:$52 sps:$4 sm:$0x3f]  }
  0x18   :  { %1349 = vmatprep.subr.bf16.mxu0 %v2162_v23  ;;  %1389 = vmatpush1.bf16.msra.mxu1 %v2164_v24  ;;  %v2225_v3 = vld [vmem:[%s3244_s1 + $0x14] ss:$52 sps:$4 sm:$0xff]   ;;  %v1305_v4 = vsel %vm1297_vm1, %v2222_v1, 0  ;;  %v2231_v5 = vld [vmem:[%s3244_s1 + $0x1c] ss:$52 sps:$4 sm:$0xff]  }
  0x19   :  { %1390 = vmatprep.subr.bf16.mxu1 %v2166_v25  ;;  %v2223_v6 = vld [vmem:[%s3244_s1 + $0x10] ss:$52 sps:$4 sm:$0xff]   ;;  %v2229_v8 = vld [vmem:[%s3244_s1 + $0x18] ss:$52 sps:$4 sm:$0xff]   ;;  %v2235_v12 = vld [vmem:[%s3244_s1 + $0x80] ss:$52 sps:$4 sm:$0xff]  }
  0x1a   :  { %v2228_v7 = vld [vmem:[%s3244_s1 + $0x7c] ss:$52 sps:$4 sm:$0xff]   ;;  %v2237_v9 = vld [vmem:[%s3244_s1 + $0x84] ss:$52 sps:$4 sm:$0xff]   ;;  %v2243_v13 = vld [vmem:[%s3244_s1 + $0xec] ss:$52 sps:$4 sm:$0xff]  }
  0x1b   :  { %1350 = vmatpush1.bf16.msra.mxu0 %v2165_v26  ;;  %v2226_v10 = vld [vmem:[%s3244_s1 + $0x78] ss:$52 sps:$4 sm:$0xff]   ;;  %v2232_v14 = vld [vmem:[%s3244_s1 + $0xe0] ss:$52 sps:$4 sm:$0xff]   ;;  %v2241_v16 = vld [vmem:[%s3244_s1 + $0xe8] ss:$52 sps:$4 sm:$0xff]  }
  0x1c   :  { %1351 = vmatprep.subr.bf16.mxu0 %v2168_v27  ;;  %1391 = vmatpush1.bf16.msra.mxu1 %v2170_v28  ;;  %v2234_v11 = vld [vmem:[%s3244_s1 + $0xe4] ss:$52 sps:$4 sm:$0xff]   ;;  %v2240_v15 = vld [vmem:[%s3244_s1 + $0x14c] ss:$52 sps:$4 sm:$0xff]   ;;  %v2249_v17 = vld [vmem:[%s3244_s1 + $0x154] ss:$52 sps:$4 sm:$0xff]  }
  0x1d   :  { %1392 = vmatprep.subr.bf16.mxu1 %v2172_v29  ;;  %v2238_v18 = vld [vmem:[%s3244_s1 + $0x148] ss:$52 sps:$4 sm:$0xff]   ;;  %v2247_v20 = vld [vmem:[%s3244_s1 + $0x150] ss:$52 sps:$4 sm:$0xff]   ;;  %v2253_v24 = vld [vmem:[%s3244_s1 + $0x1b8] ss:$52 sps:$4 sm:$0xff]  }
  0x1e   :  { %v2246_v19 = vld [vmem:[%s3244_s1 + $0x1b4] ss:$52 sps:$4 sm:$0xff]   ;;  %v2255_v21 = vld [vmem:[%s3244_s1 + $0x1bc] ss:$52 sps:$4 sm:$0xff]   ;;  %v2261_v25 = vld [vmem:[%s3244_s1 + $0x224] ss:$52 sps:$4 sm:$0xff]  }
  0x1f   :  { %1352 = vmatpush1.bf16.msra.mxu0 %v2171_v30  ;;  %v2244_v22 = vld [vmem:[%s3244_s1 + $0x1b0] ss:$52 sps:$4 sm:$0xff]   ;;  %v2250_v26 = vld [vmem:[%s3244_s1 + $0x218] ss:$52 sps:$4 sm:$0xff]   ;;  %v2259_v28 = vld [vmem:[%s3244_s1 + $0x220] ss:$52 sps:$4 sm:$0xff]  }
  0x20   :  { %1353 = vmatprep.subr.bf16.mxu0 %v2174_v31  ;;  %1393 = vmatpush1.bf16.msra.mxu1 %v2176_v32  ;;  %v2252_v23 = vld [vmem:[%s3244_s1 + $0x21c] ss:$52 sps:$4 sm:$0xff]   ;;  %v2258_v27 = vld [vmem:[%s3244_s1 + $0x284] ss:$52 sps:$4 sm:$0xff]   ;;  %v2267_v29 = vld [vmem:[%s3244_s1 + $0x28c] ss:$52 sps:$4 sm:$0xff]  }
  0x21   :  { %1394 = vmatprep.subr.bf16.mxu1 %v2178_v33  ;;  %v2256_v30 = vld [vmem:[%s3244_s1 + $0x280] ss:$52 sps:$4 sm:$0xff]   ;;  %v2265_v32 = vld [vmem:[%s3244_s1 + $0x288] ss:$52 sps:$4 sm:$0xff]  }
  0x22   :  { %v2264_v31 = vld [vmem:[%s3244_s1 + $0x2ec] ss:$52 sps:$4 sm:$0xff]   ;;  %v2273_v33 = vld [vmem:[%s3244_s1 + $0x2f4] ss:$52 sps:$4 sm:$0xff]  }
  0x23   :  { %1354 = vmatpush1.bf16.msra.mxu0 %v2177_v34  ;;  %v2262_v34 = vld [vmem:[%s3244_s1 + $0x2e8] ss:$52 sps:$4 sm:$0xff]   ;;  %v2304_v62 = vld [vmem:[%s3244_s1 + $0x5c0] ss:$52 sps:$4 sm:$0xff]  }
  0x24   :  { %1355 = vmatprep.subr.bf16.mxu0 %v2180_v35  ;;  %1395 = vmatpush1.bf16.msra.mxu1 %v2182_v36  ;;  %v2270_v35 = vld [vmem:[%s3244_s1 + $0x354] ss:$52 sps:$4 sm:$0xff]   ;;  %v2271_v36 = vld [vmem:[%s3244_s1 + $0x2f0] ss:$52 sps:$4 sm:$0xff]  }
  0x25   :  { %1396 = vmatprep.subr.bf16.mxu1 %v2184_v37  ;;  %v2279_v37 = vld [vmem:[%s3244_s1 + $0x35c] ss:$52 sps:$4 sm:$0xff]   ;;  %v2310_v1 = vld [vmem:[%s3244_s1 + $0x62c] ss:$52 sps:$4 sm:$0x3f]  }
  0x27   :  { %1356 = vmatpush1.bf16.msra.mxu0 %v2183_v38  ;;  %v2268_v38 = vld [vmem:[%s3244_s1 + $0x350] ss:$52 sps:$4 sm:$0xff]  }
  0x28   :  { %1357 = vmatprep.subr.bf16.mxu0 %v2186_v39  ;;  %1397 = vmatpush1.bf16.msra.mxu1 %v2188_v40  ;;  %v2276_v39 = vld [vmem:[%s3244_s1 + $0x3bc] ss:$52 sps:$4 sm:$0xff]   ;;  %v2277_v40 = vld [vmem:[%s3244_s1 + $0x358] ss:$52 sps:$4 sm:$0xff]  }
  0x29   :  { %1398 = vmatprep.subr.bf16.mxu1 %v2190_v41  ;;  %v2285_v41 = vld [vmem:[%s3244_s1 + $0x3c4] ss:$52 sps:$4 sm:$0xff]  }
  0x2b   :  { %1358 = vmatpush1.bf16.msra.mxu0 %v2189_v42  ;;  %v2274_v42 = vld [vmem:[%s3244_s1 + $0x3b8] ss:$52 sps:$4 sm:$0xff]  }
  0x2c   :  { %1359 = vmatprep.subr.bf16.mxu0 %v2192_v43  ;;  %1399 = vmatpush1.bf16.msra.mxu1 %v2194_v44  ;;  %v2282_v43 = vld [vmem:[%s3244_s1 + $0x424] ss:$52 sps:$4 sm:$0xff]   ;;  %v2283_v44 = vld [vmem:[%s3244_s1 + $0x3c0] ss:$52 sps:$4 sm:$0xff]  }
  0x2d   :  { %1400 = vmatprep.subr.bf16.mxu1 %v2196_v45  ;;  %v2291_v45 = vld [vmem:[%s3244_s1 + $0x42c] ss:$52 sps:$4 sm:$0xff]  }
  0x2f   :  { %1360 = vmatpush1.bf16.msra.mxu0 %v2195_v47  ;;  %v2280_v47 = vld [vmem:[%s3244_s1 + $0x420] ss:$52 sps:$4 sm:$0xff]  }
  0x30   :  { %1361 = vmatprep.subr.bf16.mxu0 %v2198_v49  ;;  %1401 = vmatpush1.bf16.msra.mxu1 %v2200_v50  ;;  %v2288_v49 = vld [vmem:[%s3244_s1 + $0x48c] ss:$52 sps:$4 sm:$0xff]   ;;  %v2289_v50 = vld [vmem:[%s3244_s1 + $0x428] ss:$52 sps:$4 sm:$0xff]  }
  0x31   :  { %1402 = vmatprep.subr.bf16.mxu1 %v2202_v51  ;;  %v2297_v51 = vld [vmem:[%s3244_s1 + $0x494] ss:$52 sps:$4 sm:$0xff]  }
  0x33   :  { %1362 = vmatpush1.bf16.msra.mxu0 %v2201_v52  ;;  %v2286_v52 = vld [vmem:[%s3244_s1 + $0x488] ss:$52 sps:$4 sm:$0xff]  }
  0x34   :  { %1363 = vmatprep.subr.bf16.mxu0 %v2204_v53  ;;  %1403 = vmatpush1.bf16.msra.mxu1 %v2206_v54  ;;  %v2294_v53 = vld [vmem:[%s3244_s1 + $0x4f4] ss:$52 sps:$4 sm:$0xff]   ;;  %v2295_v54 = vld [vmem:[%s3244_s1 + $0x490] ss:$52 sps:$4 sm:$0xff]  }
  0x35   :  { %1404 = vmatprep.subr.bf16.mxu1 %v2208_v55  ;;  %v2303_v55 = vld [vmem:[%s3244_s1 + $0x4fc] ss:$52 sps:$4 sm:$0xff]  }
  0x37   :  { %1364 = vmatpush1.bf16.msra.mxu0 %v2207_v56  ;;  %v2292_v56 = vld [vmem:[%s3244_s1 + $0x4f0] ss:$52 sps:$4 sm:$0xff]  }
  0x38   :  { %1365 = vmatprep.subr.bf16.mxu0 %v2210_v57  ;;  %1405 = vmatpush1.bf16.msra.mxu1 %v2212_v58  ;;  %v2300_v57 = vld [vmem:[%s3244_s1 + $0x55c] ss:$52 sps:$4 sm:$0xff]   ;;  %v2301_v58 = vld [vmem:[%s3244_s1 + $0x4f8] ss:$52 sps:$4 sm:$0xff]  }
  0x39   :  { %1406 = vmatprep.subr.bf16.mxu1 %v2214_v60  ;;  %v2298_v60 = vld [vmem:[%s3244_s1 + $0x558] ss:$52 sps:$4 sm:$0xff]  }
  0x3b   :  { %1366 = vmatpush1.bf16.msra.mxu0 %v2213_v59  ;;  %v2309_v59 = vld [vmem:[%s3244_s1 + $0x564] ss:$52 sps:$4 sm:$0xff]  }
  0x3c   :  { %2078 = vmatprep.subr.msk.bf16.mxu0 %vm1297_vm1, %v2216_v61  ;;  %1407 = vmatpush1.bf16.msra.mxu1 %v2218_v63  ;;  %v2306_v61 = vld [vmem:[%s3244_s1 + $0x5c4] ss:$52 sps:$4 sm:$0xff]   ;;  %v2307_v63 = vld [vmem:[%s3244_s1 + $0x560] ss:$52 sps:$4 sm:$0xff]  }
  0x3d   :  { %2080 = vmatprep.subr.msk.bf16.mxu1 %vm1297_vm1, %v2220_v0  ;;  %v2314_v0 = vld [vmem:[%s3244_s1 + $0x5cc] ss:$52 sps:$4 sm:$0xff]  }
  0x3f   :  { %1368 = vmatpush1.bf16.msra.mxu0 %v1299_v2  ;;  %v2315_v2 = vld [vmem:[%s3244_s1 + $0x628] ss:$52 sps:$4 sm:$0x3f]  }
  0x40   :  { %1419 = vmatprep.subr.bf16.mxu0 %v2225_v3  ;;  %1409 = vmatpush1.bf16.msra.mxu1 %v1305_v4  ;;  %v2312_v3 = vld [vmem:[%s3244_s1 + $0x5c8] ss:$52 sps:$4 sm:$0xff]  }
  0x41   :  { %1460 = vmatprep.subr.bf16.mxu1 %v2231_v5  ;;  %v2316_v4 = vld [vmem:[%s3244_s1 + $0x634] ss:$52 sps:$4 sm:$0x3f]   ;;  %v2321_v5 = vld [vmem:[%s3244_s1 + $0x630] ss:$52 sps:$4 sm:$0x3f]  }
  0x42   :  { %1370 = vmatmul.mubr.bf16.vlgmr.msra.gmra.mrb[0].mxu0 %v2597_v46 }
  0x43   :  { %1420 = vmatpush1.bf16.msra.mxu0 %v2223_v6  ;;  %2083 = vmatprep.mubr.msk.bf16.mxu0 %vm1293_vm0, %v2604_v48  ;;  %v1311_v6 = vsel %vm1297_vm1, %v2315_v2, 0  ;;  %v2403_v2 = vld [vmem:[%s3244_s1 + $0x570] ss:$52 sps:$4 sm:$0xff]  }
  0x44   :  { %1411 = vmatmul.mubr.bf16.vlgmr.msra.gmra.mrb[0].mxu1 %v2597_v46  ;;  %1421 = vmatprep.subr.bf16.mxu0 %v2228_v7  ;;  %v2320_v7 = vld [vmem:[%s3244_s1 + $0x24] ss:$52 sps:$4 sm:$0xff]  }
  0x45   :  { %1461 = vmatpush1.bf16.msra.mxu1 %v2229_v8  ;;  %2085 = vmatprep.mubr.msk.bf16.mxu1 %vm1293_vm0, %v2604_v48  ;;  %v1317_v8 = vsel %vm1297_vm1, %v2321_v5, 0  ;;  %v2406_v5 = vld [vmem:[%s3244_s1 + $0x63c] ss:$52 sps:$4 sm:$0x3f]  }
  0x46   :  { %1462 = vmatprep.subr.bf16.mxu1 %v2237_v9  ;;  %v2327_v9 = vld [vmem:[%s3244_s1 + $0x2c] ss:$52 sps:$4 sm:$0xff]  }
  0x47   :  { %1422 = vmatpush1.bf16.msra.mxu0 %v2226_v10  ;;  %v2318_v10 = vld [vmem:[%s3244_s1 + $0x20] ss:$52 sps:$4 sm:$0xff]  }
  0x48   :  { %1423 = vmatprep.subr.bf16.mxu0 %v2234_v11  ;;  %v2324_v11 = vld [vmem:[%s3244_s1 + $0x8c] ss:$52 sps:$4 sm:$0xff]  }
  0x49   :  { %1463 = vmatpush1.bf16.msra.mxu1 %v2235_v12  ;;  %v2325_v12 = vld [vmem:[%s3244_s1 + $0x28] ss:$52 sps:$4 sm:$0xff]  }
  0x4a   :  { %1464 = vmatprep.subr.bf16.mxu1 %v2243_v13  ;;  %v2333_v13 = vld [vmem:[%s3244_s1 + $0x94] ss:$52 sps:$4 sm:$0xff]  }
  0x4b   :  { %1424 = vmatpush1.bf16.msra.mxu0 %v2232_v14  ;;  %v2322_v14 = vld [vmem:[%s3244_s1 + $0x88] ss:$52 sps:$4 sm:$0xff]  }
  0x4c   :  { %1425 = vmatprep.subr.bf16.mxu0 %v2240_v15  ;;  %v2330_v15 = vld [vmem:[%s3244_s1 + $0xf4] ss:$52 sps:$4 sm:$0xff]  }
  0x4d   :  { %1465 = vmatpush1.bf16.msra.mxu1 %v2241_v16  ;;  %v2331_v16 = vld [vmem:[%s3244_s1 + $0x90] ss:$52 sps:$4 sm:$0xff]  }
  0x4e   :  { %1466 = vmatprep.subr.bf16.mxu1 %v2249_v17  ;;  %v2339_v17 = vld [vmem:[%s3244_s1 + $0xfc] ss:$52 sps:$4 sm:$0xff]  }
  0x4f   :  { %1426 = vmatpush1.bf16.msra.mxu0 %v2238_v18  ;;  %v2328_v18 = vld [vmem:[%s3244_s1 + $0xf0] ss:$52 sps:$4 sm:$0xff]  }
  0x50   :  { %1427 = vmatprep.subr.bf16.mxu0 %v2246_v19  ;;  %v2336_v19 = vld [vmem:[%s3244_s1 + $0x15c] ss:$52 sps:$4 sm:$0xff]  }
  0x51   :  { %1467 = vmatpush1.bf16.msra.mxu1 %v2247_v20  ;;  %v2337_v20 = vld [vmem:[%s3244_s1 + $0xf8] ss:$52 sps:$4 sm:$0xff]  }
  0x52   :  { %1468 = vmatprep.subr.bf16.mxu1 %v2255_v21  ;;  %v2345_v21 = vld [vmem:[%s3244_s1 + $0x164] ss:$52 sps:$4 sm:$0xff]  }
  0x53   :  { %1428 = vmatpush1.bf16.msra.mxu0 %v2244_v22  ;;  %v2334_v22 = vld [vmem:[%s3244_s1 + $0x158] ss:$52 sps:$4 sm:$0xff]  }
  0x54   :  { %1429 = vmatprep.subr.bf16.mxu0 %v2252_v23  ;;  %v2342_v23 = vld [vmem:[%s3244_s1 + $0x1c4] ss:$52 sps:$4 sm:$0xff]  }
  0x55   :  { %1469 = vmatpush1.bf16.msra.mxu1 %v2253_v24  ;;  %v2340_v24 = vld [vmem:[%s3244_s1 + $0x1c0] ss:$52 sps:$4 sm:$0xff]  }
  0x56   :  { %1470 = vmatprep.subr.bf16.mxu1 %v2261_v25  ;;  %v2343_v25 = vld [vmem:[%s3244_s1 + $0x160] ss:$52 sps:$4 sm:$0xff]  }
  0x57   :  { %1430 = vmatpush1.bf16.msra.mxu0 %v2250_v26  ;;  %v2351_v26 = vld [vmem:[%s3244_s1 + $0x1cc] ss:$52 sps:$4 sm:$0xff]  }
  0x58   :  { %1431 = vmatprep.subr.bf16.mxu0 %v2258_v27  ;;  %v2348_v27 = vld [vmem:[%s3244_s1 + $0x22c] ss:$52 sps:$4 sm:$0xff]  }
  0x59   :  { %1471 = vmatpush1.bf16.msra.mxu1 %v2259_v28  ;;  %v2349_v28 = vld [vmem:[%s3244_s1 + $0x1c8] ss:$52 sps:$4 sm:$0xff]  }
  0x5a   :  { %1472 = vmatprep.subr.bf16.mxu1 %v2267_v29  ;;  %v2357_v29 = vld [vmem:[%s3244_s1 + $0x234] ss:$52 sps:$4 sm:$0xff]  }
  0x5b   :  { %1432 = vmatpush1.bf16.msra.mxu0 %v2256_v30  ;;  %v2346_v30 = vld [vmem:[%s3244_s1 + $0x228] ss:$52 sps:$4 sm:$0xff]  }
  0x5c   :  { %1433 = vmatprep.subr.bf16.mxu0 %v2264_v31  ;;  %v2354_v31 = vld [vmem:[%s3244_s1 + $0x294] ss:$52 sps:$4 sm:$0xff]  }
  0x5d   :  { %1473 = vmatpush1.bf16.msra.mxu1 %v2265_v32  ;;  %v2355_v32 = vld [vmem:[%s3244_s1 + $0x230] ss:$52 sps:$4 sm:$0xff]  }
  0x5e   :  { %1474 = vmatprep.subr.bf16.mxu1 %v2273_v33  ;;  %v2363_v33 = vld [vmem:[%s3244_s1 + $0x29c] ss:$52 sps:$4 sm:$0xff]  }
  0x5f   :  { %1434 = vmatpush1.bf16.msra.mxu0 %v2262_v34  ;;  %v2352_v34 = vld [vmem:[%s3244_s1 + $0x290] ss:$52 sps:$4 sm:$0xff]  }
  0x60   :  { %1435 = vmatprep.subr.bf16.mxu0 %v2270_v35  ;;  %v2360_v35 = vld [vmem:[%s3244_s1 + $0x2fc] ss:$52 sps:$4 sm:$0xff]  }
  0x61   :  { %1475 = vmatpush1.bf16.msra.mxu1 %v2271_v36  ;;  %v2361_v36 = vld [vmem:[%s3244_s1 + $0x298] ss:$52 sps:$4 sm:$0xff]  }
  0x62   :  { %1476 = vmatprep.subr.bf16.mxu1 %v2279_v37  ;;  %v2369_v37 = vld [vmem:[%s3244_s1 + $0x304] ss:$52 sps:$4 sm:$0xff]  }
  0x63   :  { %1436 = vmatpush1.bf16.msra.mxu0 %v2268_v38  ;;  %v2358_v38 = vld [vmem:[%s3244_s1 + $0x2f8] ss:$52 sps:$4 sm:$0xff]  }
  0x64   :  { %1437 = vmatprep.subr.bf16.mxu0 %v2276_v39  ;;  %v2366_v39 = vld [vmem:[%s3244_s1 + $0x364] ss:$52 sps:$4 sm:$0xff]  }
  0x65   :  { %1477 = vmatpush1.bf16.msra.mxu1 %v2277_v40  ;;  %v2367_v40 = vld [vmem:[%s3244_s1 + $0x300] ss:$52 sps:$4 sm:$0xff]  }
  0x66   :  { %1478 = vmatprep.subr.bf16.mxu1 %v2285_v41  ;;  %v2375_v41 = vld [vmem:[%s3244_s1 + $0x36c] ss:$52 sps:$4 sm:$0xff]  }
  0x67   :  { %1438 = vmatpush1.bf16.msra.mxu0 %v2274_v42  ;;  %v2364_v42 = vld [vmem:[%s3244_s1 + $0x360] ss:$52 sps:$4 sm:$0xff]  }
  0x68   :  { %1439 = vmatprep.subr.bf16.mxu0 %v2282_v43  ;;  %v2372_v43 = vld [vmem:[%s3244_s1 + $0x3cc] ss:$52 sps:$4 sm:$0xff]  }
  0x69   :  { %1479 = vmatpush1.bf16.msra.mxu1 %v2283_v44  ;;  %v2373_v44 = vld [vmem:[%s3244_s1 + $0x368] ss:$52 sps:$4 sm:$0xff]  }
  0x6a   :  { %1480 = vmatprep.subr.bf16.mxu1 %v2291_v45  ;;  %v2381_v45 = vld [vmem:[%s3244_s1 + $0x3d4] ss:$52 sps:$4 sm:$0xff]  }
  0x6b   :  { %1440 = vmatpush1.bf16.msra.mxu0 %v2280_v47  ;;  %v2370_v47 = vld [vmem:[%s3244_s1 + $0x3c8] ss:$52 sps:$4 sm:$0xff]  }
  0x6c   :  { %1441 = vmatprep.subr.bf16.mxu0 %v2288_v49  ;;  %v2378_v49 = vld [vmem:[%s3244_s1 + $0x434] ss:$52 sps:$4 sm:$0xff]  }
  0x6d   :  { %1481 = vmatpush1.bf16.msra.mxu1 %v2289_v50  ;;  %v2379_v50 = vld [vmem:[%s3244_s1 + $0x3d0] ss:$52 sps:$4 sm:$0xff]  }
  0x6e   :  { %1482 = vmatprep.subr.bf16.mxu1 %v2297_v51  ;;  %v2387_v51 = vld [vmem:[%s3244_s1 + $0x43c] ss:$52 sps:$4 sm:$0xff]  }
  0x6f   :  { %1442 = vmatpush1.bf16.msra.mxu0 %v2286_v52  ;;  %v2376_v52 = vld [vmem:[%s3244_s1 + $0x430] ss:$52 sps:$4 sm:$0xff]  }
  0x70   :  { %1443 = vmatprep.subr.bf16.mxu0 %v2294_v53  ;;  %v2384_v53 = vld [vmem:[%s3244_s1 + $0x49c] ss:$52 sps:$4 sm:$0xff]  }
  0x71   :  { %1483 = vmatpush1.bf16.msra.mxu1 %v2295_v54  ;;  %v2385_v54 = vld [vmem:[%s3244_s1 + $0x438] ss:$52 sps:$4 sm:$0xff]  }
  0x72   :  { %1484 = vmatprep.subr.bf16.mxu1 %v2303_v55  ;;  %v2393_v55 = vld [vmem:[%s3244_s1 + $0x4a4] ss:$52 sps:$4 sm:$0xff]  }
  0x73   :  { %1444 = vmatpush1.bf16.msra.mxu0 %v2292_v56  ;;  %v2382_v56 = vld [vmem:[%s3244_s1 + $0x498] ss:$52 sps:$4 sm:$0xff]  }
  0x74   :  { %1445 = vmatprep.subr.bf16.mxu0 %v2300_v57  ;;  %v2390_v57 = vld [vmem:[%s3244_s1 + $0x504] ss:$52 sps:$4 sm:$0xff]  }
  0x75   :  { %1485 = vmatpush1.bf16.msra.mxu1 %v2301_v58  ;;  %v2391_v58 = vld [vmem:[%s3244_s1 + $0x4a0] ss:$52 sps:$4 sm:$0xff]  }
  0x76   :  { %1486 = vmatprep.subr.bf16.mxu1 %v2309_v59  ;;  %v2399_v59 = vld [vmem:[%s3244_s1 + $0x50c] ss:$52 sps:$4 sm:$0xff]  }
  0x77   :  { %1446 = vmatpush1.bf16.msra.mxu0 %v2298_v60  ;;  %v2388_v60 = vld [vmem:[%s3244_s1 + $0x500] ss:$52 sps:$4 sm:$0xff]  }
  0x78   :  { %1447 = vmatprep.subr.bf16.mxu0 %v2306_v61  ;;  %v2396_v61 = vld [vmem:[%s3244_s1 + $0x56c] ss:$52 sps:$4 sm:$0xff]  }
  0x79   :  { %1487 = vmatpush1.bf16.msra.mxu1 %v2307_v63  ;;  %v2405_v63 = vld [vmem:[%s3244_s1 + $0x574] ss:$52 sps:$4 sm:$0xff]  }
  0x7a   :  { %1488 = vmatprep.subr.bf16.mxu1 %v2314_v0  ;;  %v2394_v0 = vld [vmem:[%s3244_s1 + $0x568] ss:$52 sps:$4 sm:$0xff]  }
  0x7b   :  { %1448 = vmatpush1.bf16.msra.mxu0 %v2304_v62  ;;  %v2397_v62 = vld [vmem:[%s3244_s1 + $0x508] ss:$52 sps:$4 sm:$0xff]  }
  0x7c   :  { %2082 = vmatprep.subr.msk.bf16.mxu0 %vm1297_vm1, %v2310_v1  ;;  %v2402_v1 = vld [vmem:[%s3244_s1 + $0x5d4] ss:$52 sps:$4 sm:$0xff]  }
  0x7d   :  { %1489 = vmatpush1.bf16.msra.mxu1 %v2312_v3  ;;  %v2410_v3 = vld [vmem:[%s3244_s1 + $0x5dc] ss:$52 sps:$4 sm:$0xff]  }
  0x7e   :  { %2084 = vmatprep.subr.msk.bf16.mxu1 %vm1297_vm1, %v2316_v4  ;;  %v2400_v4 = vld [vmem:[%s3244_s1 + $0x5d0] ss:$52 sps:$4 sm:$0xff]  }
  0x7f   :  { %1450 = vmatpush1.bf16.msra.mxu0 %v1311_v6  ;;  %v2411_v6 = vld [vmem:[%s3244_s1 + $0x638] ss:$52 sps:$4 sm:$0x3f]  }
  0x80   :  { %1501 = vmatprep.subr.bf16.mxu0 %v2320_v7  ;;  %v2408_v7 = vld [vmem:[%s3244_s1 + $0x5d8] ss:$52 sps:$4 sm:$0xff]  }
  0x81   :  { %1491 = vmatpush1.bf16.msra.mxu1 %v1317_v8  ;;  %v2412_v8 = vld [vmem:[%s3244_s1 + $0x644] ss:$52 sps:$4 sm:$0x3f]  }
  0x82   :  { %1452 = vmatmul.mubr.bf16.vlgmr.msra.gmra.mrb[4].mxu0 %v2597_v46  ;;  %1542 = vmatprep.subr.bf16.mxu1 %v2327_v9  ;;  %v2415_v9 = vld [vmem:[%s3244_s1 + $0x640] ss:$52 sps:$4 sm:$0x3f]  }
  0x83   :  { %1502 = vmatpush1.bf16.msra.mxu0 %v2318_v10  ;;  %2087 = vmatprep.mubr.msk.bf16.mxu0 %vm1293_vm0, %v2604_v48  ;;  %v1323_v10 = vsel %vm1297_vm1, %v2411_v6, 0 }
  0x84   :  { %1493 = vmatmul.mubr.bf16.vlgmr.msra.gmra.mrb[4].mxu1 %v2597_v46  ;;  %1503 = vmatprep.subr.bf16.mxu0 %v2324_v11  ;;  %v2414_v11 = vld [vmem:[%s3244_s1 + $0x370] ss:$52 sps:$4 sm:$0xff]  }
  0x85   :  { %1543 = vmatpush1.bf16.msra.mxu1 %v2325_v12  ;;  %2089 = vmatprep.mubr.msk.bf16.mxu1 %vm1293_vm0, %v2604_v48  ;;  %v1329_v12 = vsel %vm1297_vm1, %v2415_v9, 0 }
  0x86   :  { %1544 = vmatprep.subr.bf16.mxu1 %v2333_v13  ;;  %v2416_v13 = vld [vmem:[%s3244_s1 + $0x30] ss:$52 sps:$4 sm:$0xff]  }
  0x87   :  { %1504 = vmatpush1.bf16.msra.mxu0 %v2322_v14  ;;  %v2417_v14 = vld [vmem:[%s3244_s1 + $0x3d8] ss:$52 sps:$4 sm:$0xff]  }
  0x88   :  { %1505 = vmatprep.subr.bf16.mxu0 %v2330_v15  ;;  %v2418_v15 = vld [vmem:[%s3244_s1 + $0x98] ss:$52 sps:$4 sm:$0xff]  }
  0x89   :  { %1545 = vmatpush1.bf16.msra.mxu1 %v2331_v16  ;;  %v2419_v16 = vld [vmem:[%s3244_s1 + $0x440] ss:$52 sps:$4 sm:$0xff]  }
  0x8a   :  { %1546 = vmatprep.subr.bf16.mxu1 %v2339_v17  ;;  %v2420_v17 = vld [vmem:[%s3244_s1 + $0x100] ss:$52 sps:$4 sm:$0xff]  }
  0x8b   :  { %1506 = vmatpush1.bf16.msra.mxu0 %v2328_v18  ;;  %v2421_v18 = vld [vmem:[%s3244_s1 + $0x4a8] ss:$52 sps:$4 sm:$0xff]  }
  0x8c   :  { %1507 = vmatprep.subr.bf16.mxu0 %v2336_v19  ;;  %v2423_v19 = vld [vmem:[%s3244_s1 + $0x510] ss:$52 sps:$4 sm:$0xff]  }
  0x8d   :  { %1547 = vmatpush1.bf16.msra.mxu1 %v2337_v20  ;;  %v2424_v20 = vld [vmem:[%s3244_s1 + $0x1d0] ss:$52 sps:$4 sm:$0xff]  }
  0x8e   :  { %1548 = vmatprep.subr.bf16.mxu1 %v2345_v21  ;;  %v2425_v21 = vld [vmem:[%s3244_s1 + $0x578] ss:$52 sps:$4 sm:$0xff]  }
  0x8f   :  { %1508 = vmatpush1.bf16.msra.mxu0 %v2334_v22  ;;  %v2426_v22 = vld [vmem:[%s3244_s1 + $0x238] ss:$52 sps:$4 sm:$0xff]  }
  0x90   :  { %1509 = vmatprep.subr.bf16.mxu0 %v2342_v23  ;;  %v2427_v23 = vld [vmem:[%s3244_s1 + $0x5e0] ss:$52 sps:$4 sm:$0xff]  }
  0x91   :  { %1549 = vmatpush1.bf16.msra.mxu1 %v2343_v25  ;;  %v2429_v25 = vld [vmem:[%s3244_s1 + $0x648] ss:$52 sps:$4 sm:$0x3f]  }
  0x92   :  { %1550 = vmatprep.subr.bf16.mxu1 %v2351_v26  ;;  %v2430_v26 = vld [vmem:[%s3244_s1 + $0x308] ss:$52 sps:$4 sm:$0xff]  }
  0x93   :  { %1510 = vmatpush1.bf16.msra.mxu0 %v2340_v24  ;;  %v2428_v24 = vld [vmem:[%s3244_s1 + $0x2a0] ss:$52 sps:$4 sm:$0xff]  }
  0x94   :  { %1511 = vmatprep.subr.bf16.mxu0 %v2348_v27 }
  0x95   :  { %1551 = vmatpush1.bf16.msra.mxu1 %v2349_v28 }
  0x96   :  { %1552 = vmatprep.subr.bf16.mxu1 %v2357_v29 }
  0x97   :  { %1512 = vmatpush1.bf16.msra.mxu0 %v2346_v30 }
  0x98   :  { %1513 = vmatprep.subr.bf16.mxu0 %v2354_v31 }
  0x99   :  { %1553 = vmatpush1.bf16.msra.mxu1 %v2355_v32 }
  0x9a   :  { %1554 = vmatprep.subr.bf16.mxu1 %v2363_v33 }
  0x9b   :  { %1514 = vmatpush1.bf16.msra.mxu0 %v2352_v34 }
  0x9c   :  { %1515 = vmatprep.subr.bf16.mxu0 %v2360_v35 }
  0x9d   :  { %1555 = vmatpush1.bf16.msra.mxu1 %v2361_v36 }
  0x9e   :  { %1556 = vmatprep.subr.bf16.mxu1 %v2369_v37 }
  0x9f   :  { %1516 = vmatpush1.bf16.msra.mxu0 %v2358_v38 }
  0xa0   :  { %1517 = vmatprep.subr.bf16.mxu0 %v2366_v39 }
  0xa1   :  { %1557 = vmatpush1.bf16.msra.mxu1 %v2367_v40 }
  0xa2   :  { %1558 = vmatprep.subr.bf16.mxu1 %v2375_v41 }
  0xa3   :  { %1518 = vmatpush1.bf16.msra.mxu0 %v2364_v42 }
  0xa4   :  { %1519 = vmatprep.subr.bf16.mxu0 %v2372_v43 }
  0xa5   :  { %1559 = vmatpush1.bf16.msra.mxu1 %v2373_v44 }
  0xa6   :  { %1560 = vmatprep.subr.bf16.mxu1 %v2381_v45 }
  0xa7   :  { %1520 = vmatpush1.bf16.msra.mxu0 %v2370_v47 }
  0xa8   :  { %1521 = vmatprep.subr.bf16.mxu0 %v2378_v49 }
  0xa9   :  { %1561 = vmatpush1.bf16.msra.mxu1 %v2379_v50 }
  0xaa   :  { %1562 = vmatprep.subr.bf16.mxu1 %v2387_v51 }
  0xab   :  { %1522 = vmatpush1.bf16.msra.mxu0 %v2376_v52 }
  0xac   :  { %1523 = vmatprep.subr.bf16.mxu0 %v2384_v53 }
  0xad   :  { %1563 = vmatpush1.bf16.msra.mxu1 %v2385_v54  ;;  %v2433_v54 = vmov 0  }
  0xae   :  { %1564 = vmatprep.subr.bf16.mxu1 %v2393_v55  ;;  %2124 = vset.pattern.permute.xlu1 %v2433_v54  ;;  %v1696_v55 = vld [vmem:[%s3246_s2] sm:$0xf] }
  0xaf   :  { %1524 = vmatpush1.bf16.msra.mxu0 %v2382_v56  ;;  %v2434_v56 = vmov 1   ;;  %1727 = vperm.xlu1 %2124, %v1696_v55  }
  0xb0   :  { %1525 = vmatprep.subr.bf16.mxu0 %v2390_v57  ;;  %2126 = vset.pattern.permute.xlu0 %v2434_v56 }
  0xb1   :  { %1565 = vmatpush1.bf16.msra.mxu1 %v2391_v58 }
  0xb2   :  { %1566 = vmatprep.subr.bf16.mxu1 %v2399_v59 }
  0xb3   :  { %1526 = vmatpush1.bf16.msra.mxu0 %v2388_v60  ;;  %2125 = vset.pattern.permute.xlu1 %v2434_v56 }
  0xb4   :  { %1527 = vmatprep.subr.bf16.mxu0 %v2396_v61  ;;  %1744 = vperm.xlu1 %2125, %v1696_v55  }
  0xb5   :  { %1567 = vmatpush1.bf16.msra.mxu1 %v2397_v62 }
  0xb6   :  { %1568 = vmatprep.subr.bf16.mxu1 %v2405_v63 }
  0xb7   :  { %1528 = vmatpush1.bf16.msra.mxu0 %v2394_v0 }
  0xb8   :  { %1529 = vmatprep.subr.bf16.mxu0 %v2402_v1 }
  0xb9   :  { %1569 = vmatpush1.bf16.msra.mxu1 %v2403_v2 }
  0xba   :  { %1570 = vmatprep.subr.bf16.mxu1 %v2410_v3 }
  0xbb   :  { %1530 = vmatpush1.bf16.msra.mxu0 %v2400_v4 }
  0xbc   :  { %2086 = vmatprep.subr.msk.bf16.mxu0 %vm1297_vm1, %v2406_v5 }
  0xbd   :  { %1571 = vmatpush1.bf16.msra.mxu1 %v2408_v7 }
  0xbe   :  { %2088 = vmatprep.subr.msk.bf16.mxu1 %vm1297_vm1, %v2412_v8 }
  0xbf   :  { %1532 = vmatpush1.bf16.msra.mxu0 %v1323_v10 }
  0xc0   :  { %2098 = vmatprep.subr.bf16.mxu0 %v2414_v11 }
  0xc1   :  { %1573 = vmatpush1.bf16.msra.mxu1 %v1329_v12 }
  0xc2   :  { %1534 = vmatmul.mubr.bf16.vlgmr.msra.gmra.mrb[8].mxu0 %v2597_v46 }
  0xc3   :  { %2099 = vmatpush3.bf16.msra.mxu0 %v2416_v13  ;;  %2090 = vmatprep.mubr.msk.bf16.mxu0 %vm1293_vm0, %v2604_v48  ;;  %v2422_v48 = vld [vmem:[%s3244_s1 + $0x168] ss:$52 sps:$4 sm:$0xff]  }
  0xc4   :  { %1575 = vmatmul.mubr.bf16.vlgmr.msra.gmra.mrb[8].mxu1 %v2597_v46  ;;  %2100 = vmatprep.subr.bf16.mxu0 %v2417_v14 }
  0xc7   :  { %2101 = vmatpush3.bf16.msra.mxu0 %v2418_v15 }
  0xc8   :  { %2102 = vmatprep.subr.bf16.mxu0 %v2419_v16 }
  0xcb   :  { %2103 = vmatpush3.bf16.msra.mxu0 %v2420_v17 }
  0xcc   :  { %2104 = vmatprep.subr.bf16.mxu0 %v2421_v18 }
  0xcf   :  { %2105 = vmatpush3.bf16.msra.mxu0 %v2422_v48 }
  0xd0   :  { %2106 = vmatprep.subr.bf16.mxu0 %v2423_v19 }
  0xd3   :  { %2107 = vmatpush3.bf16.msra.mxu0 %v2424_v20 }
  0xd4   :  { %2108 = vmatprep.subr.bf16.mxu0 %v2425_v21 }
  0xd7   :  { %2109 = vmatpush3.bf16.msra.mxu0 %v2426_v22 }
  0xd8   :  { %2110 = vmatprep.subr.bf16.mxu0 %v2427_v23 }
  0xdb   :  { %2111 = vmatpush3.bf16.msra.mxu0 %v2428_v24 }
  0xdc   :  { %2120 = vmatprep.subr.msk.bf16.mxu0 %vm1297_vm1, %v2429_v25 }
  0xdf   :  { %2113 = vmatpush3.bf16.msra.mxu0 %v2430_v26 }
  0xe2   :  { %1616 = vmatmul.mubr.bf16.vlgmr.msra.gmra.mrb[12].mxu0 %v2597_v46 }
 0x115   :  { %v3123_v27 = vpop.f32.mrb[0].mxu0 }
 0x116   :  { %v1624_v28 = vsel %vm1623_vm2, %v3123_v27, 0.0  ;;  %v1652_v29 = vmul.f32 %v3123_v27, %v3123_v27  ;;  %v3129_v30 = vpop.f32.mrb[1].mxu0 }
 0x117   :  { %v1625_v31 = vsel %vm1623_vm2, %v3129_v30, 0.0  ;;  %v1653_v32 = vmul.f32 %v3129_v30, %v3129_v30  ;;  %v1375_v33 = vpop.f32.mrb[2].mxu0  ;;  %v3135_v34 = vpop.f32.mrb[0].mxu1 }
 0x118   :  { %v1665_v46 = vsel %vm1623_vm2, %v1652_v29, 0.0  ;;  %v1626_v35 = vadd.f32 %v1625_v31, %v1624_v28  ;;  %v1376_v36 = vpop.f32.mrb[3].mxu0  ;;  %v1627_v37 = vsel %vm1623_vm2, %v3135_v34, 0.0  ;;  %v1654_v38 = vmul.f32 %v3135_v34, %v3135_v34  ;;  %v3142_v39 = vpop.f32.mrb[1].mxu1 }
 0x119   :  { %v1666_v40 = vsel %vm1623_vm2, %v1653_v32, 0.0  ;;  %v1629_v41 = vsel %vm1623_vm2, %v3142_v39, 0.0  ;;  %v1655_v42 = vmul.f32 %v3142_v39, %v3142_v39  ;;  %v1416_v43 = vpop.f32.mrb[2].mxu1 }
 0x11a   :  { %v1667_v44 = vadd.f32 %v1666_v40, %v1665_v46  ;;  %v1628_v45 = vadd.f32 %v1627_v37, %v1626_v35  ;;  %v1668_v47 = vsel %vm1623_vm2, %v1654_v38, 0.0  ;;  %v1417_v49 = vpop.f32.mrb[3].mxu1 }
 0x11b   :  { %v1670_v50 = vsel %vm1623_vm2, %v1655_v42, 0.0 }
 0x11c   :  { %v1669_v51 = vadd.f32 %v1668_v47, %v1667_v44  ;;  %v1630_v52 = vadd.f32 %v1629_v41, %v1628_v45 }
 0x11e   :  { %v1671_v53 = vadd.f32 %v1670_v50, %v1669_v51 }
 0x155   :  { %v3154_v57 = vpop.f32.mrb[4].mxu0 }
 0x156   :  { %v1631_v58 = vsel %vm1623_vm2, %v3154_v57, 0.0  ;;  %v1656_v59 = vmul.f32 %v3154_v57, %v3154_v57  ;;  %v3160_v60 = vpop.f32.mrb[5].mxu0 }
 0x157   :  { %v1632_v61 = vadd.f32 %v1631_v58, %v1630_v52  ;;  %v1633_v62 = vsel %vm1623_vm2, %v3160_v60, 0.0  ;;  %v1657_v63 = vmul.f32 %v3160_v60, %v3160_v60  ;;  %v1457_v0 = vpop.f32.mrb[6].mxu0  ;;  %v3166_v1 = vpop.f32.mrb[4].mxu1 }
 0x158   :  { %v1672_v2 = vsel %vm1623_vm2, %v1656_v59, 0.0  ;;  %v1458_v3 = vpop.f32.mrb[7].mxu0  ;;  %v1635_v4 = vsel %vm1623_vm2, %v3166_v1, 0.0  ;;  %v1658_v5 = vmul.f32 %v3166_v1, %v3166_v1  ;;  %v3173_v6 = vpop.f32.mrb[5].mxu1 }
 0x159   :  { %v1673_v7 = vadd.f32 %v1672_v2, %v1671_v53  ;;  %v1634_v8 = vadd.f32 %v1633_v62, %v1632_v61  ;;  %v1674_v9 = vsel %vm1623_vm2, %v1657_v63, 0.0  ;;  %v1498_v10 = vpop.f32.mrb[6].mxu1  ;;  %v1637_v12 = vsel %vm1623_vm2, %v3173_v6, 0.0 }
 0x15a   :  { %v1676_v11 = vsel %vm1623_vm2, %v1658_v5, 0.0  ;;  %v1659_v13 = vmul.f32 %v3173_v6, %v3173_v6  ;;  %v1499_v14 = vpop.f32.mrb[7].mxu1 }
 0x15b   :  { %v1675_v15 = vadd.f32 %v1674_v9, %v1673_v7  ;;  %v1636_v16 = vadd.f32 %v1635_v4, %v1634_v8 }
 0x15c   :  { %v1678_v17 = vsel %vm1623_vm2, %v1659_v13, 0.0  ;;  %v1804_v13 = vlaneseq }
 0x15d   :  { %v1677_v18 = vadd.f32 %v1676_v11, %v1675_v15  ;;  %v1638_v48 = vadd.f32 %v1637_v12, %v1636_v16  ;;  %v2435_v11 = vmov 1983009808  }
 0x15e   :  { %v1802_v12 = vunpack.c.l.s4 %v2435_v11  ;;  %v1805_v15 = vshrl.u32 %v1804_v13, 7 }
 0x15f   :  { %v1679_v19 = vadd.f32 %v1678_v17, %v1677_v18  ;;  %v1728_v18 = vpop.permute.xlu1 %1727 }
 0x160   :  { %v1803_v14 = vunpack.c.0.s8 %v1802_v12 }
 0x162   :  { %v3212_v16 = vsub.s32 %v1803_v14, %v1805_v15 }
 0x195   :  { %v3182_v20 = vpop.f32.mrb[8].mxu0 }
 0x196   :  { %v1639_v21 = vsel %vm1623_vm2, %v3182_v20, 0.0  ;;  %v1660_v22 = vmul.f32 %v3182_v20, %v3182_v20  ;;  %v3188_v23 = vpop.f32.mrb[9].mxu0 }
 0x197   :  { %v1640_v24 = vadd.f32 %v1639_v21, %v1638_v48  ;;  %v1641_v25 = vsel %vm1623_vm2, %v3188_v23, 0.0  ;;  %v1661_v26 = vmul.f32 %v3188_v23, %v3188_v23  ;;  %v1539_v28 = vpop.f32.mrb[10].mxu0  ;;  %v3194_v29 = vpop.f32.mrb[8].mxu1 }
 0x198   :  { %v1680_v31 = vsel %vm1623_vm2, %v1660_v22, 0.0  ;;  %v1540_v32 = vpop.f32.mrb[11].mxu0  ;;  %v1643_v33 = vsel %vm1623_vm2, %v3194_v29, 0.0  ;;  %v1662_v46 = vmul.f32 %v3194_v29, %v3194_v29  ;;  %v3201_v35 = vpop.f32.mrb[9].mxu1 }
 0x199   :  { %v1681_v36 = vadd.f32 %v1680_v31, %v1679_v19  ;;  %v1642_v37 = vadd.f32 %v1641_v25, %v1640_v24  ;;  %v1682_v38 = vsel %vm1623_vm2, %v1661_v26, 0.0  ;;  %v1663_v40 = vmul.f32 %v3201_v35, %v3201_v35  ;;  %v1580_v41 = vpop.f32.mrb[10].mxu1 }
 0x19a   :  { %v1684_v42 = vsel %vm1623_vm2, %v1662_v46, 0.0  ;;  %v1581_v43 = vpop.f32.mrb[11].mxu1  ;;  %v1645_v44 = vsel %vm1623_vm2, %v3201_v35, 0.0  ;;  %v1745_v41 = vpop.permute.xlu1 %1744 }
 0x19b   :  { %v1683_v45 = vadd.f32 %v1682_v38, %v1681_v36  ;;  %v1644_v47 = vadd.f32 %v1643_v33, %v1642_v37  ;;  %v1686_v49 = vsel %vm1623_vm2, %v1663_v40, 0.0 }
 0x19d   :  { %v1646_v50 = vadd.f32 %v1645_v44, %v1644_v47  ;;  %v1685_v51 = vadd.f32 %v1684_v42, %v1683_v45 }
 0x19f   :  { %v1687_v52 = vadd.f32 %v1686_v49, %v1685_v51 }
 0x1b5   :  { %v2114_v53 = vpop.f32.mrb[12].mxu0 }
 0x1b6   :  { %v2115_v54 = vpop.f32.mrb[13].mxu0 }
 0x1b7   :  { %v2116_v55 = vadd.f32 %v2115_v54, %v2114_v53  ;;  %v2117_v56 = vpop.f32.mrb[14].mxu0 }
 0x1b8   :  { %v2118_v58 = vpop.f32.mrb[15].mxu0 }
 0x1b9   :  { %v1647_v59 = vsel %vm1623_vm2, %v2116_v55, 0.0  ;;  %v1664_v61 = vmul.f32 %v2116_v55, %v2116_v55 }
 0x1ba   :  { %v1648_v62 = vadd.f32 %v1647_v59, %v1646_v50 }
 0x1bb   :  { %v1688_v63 = vsel %vm1623_vm2, %v1664_v61, 0.0 }
 0x1bc   :  { %1649 = vadd.xlane.f32.xlu0 %v1648_v62  ;;  %v1689_v0 = vadd.f32 %v1688_v63, %v1687_v52 }
 0x1c0   :  { %1690 = vadd.xlane.f32.xlu0 %v1689_v0 }
 0x249   :  { %v1650_v2 = vpop.xlane.xlu0 %1649 }
 0x24a   :  { %v1651_v3 = vmul.f32 0.0006377551, %v1650_v2 }
 0x24c   :  { %v1693_v5 = vmul.f32 %v1651_v3, %v1651_v3  ;;  %v1697_v17 = vsub.f32 %v3123_v27, %v1651_v3  ;;  %v1698_v48 = vsub.f32 %v3129_v30, %v1651_v3  ;;  %v1699_v19 = vsub.f32 %v3135_v34, %v1651_v3 }
 0x24d   :  { %v1691_v4 = vpop.xlane.xlu0 %1690  ;;  %v1700_v21 = vsub.f32 %v3142_v39, %v1651_v3  ;;  %v1701_v22 = vsub.f32 %v3154_v57, %v1651_v3  ;;  %v1702_v24 = vsub.f32 %v3160_v60, %v1651_v3  ;;  %v1703_v25 = vsub.f32 %v3166_v1, %v1651_v3 }
 0x24e   :  { %v1692_v7 = vmul.f32 0.0006377551, %v1691_v4  ;;  %v1704_v26 = vsub.f32 %v3173_v6, %v1651_v3  ;;  %v1705_v28 = vsub.f32 %v3182_v20, %v1651_v3  ;;  %v1706_v27 = vsub.f32 %v3188_v23, %v1651_v3 }
 0x24f   :  { %v1707_v32 = vsub.f32 %v3194_v29, %v1651_v3  ;;  %v1708_v30 = vsub.f32 %v3201_v35, %v1651_v3  ;;  %v1709_v34 = vsub.f32 %v2116_v55, %v1651_v3 }
 0x250   :  { %v1694_v8 = vsub.f32 %v1692_v7, %v1693_v5 }
 0x252   :  { %v1695_v9 = vmax.f32 %v1694_v8, 0.0 }
 0x254   :  { %v1710_v10 = vadd.f32 1e-05, %v1695_v9 }
 0x256   :  { %2431 = vrsqrt.f32 %v1710_v10 }
 0x260   :  { %v2432_v31 = vpop.eup %2431 }
 0x261   :  { %v1712_v33 = vmul.f32 %v2432_v31, %v1697_v17  ;;  %v1713_v39 = vmul.f32 %v2432_v31, %v1698_v48  ;;  %v1714_v46 = vmul.f32 %v2432_v31, %v1699_v19  ;;  %v1715_v57 = vmul.f32 %v2432_v31, %v1700_v21 }
 0x262   :  { %v1716_v36 = vmul.f32 %v2432_v31, %v1701_v22  ;;  %v1717_v60 = vmul.f32 %v2432_v31, %v1702_v24  ;;  %v1718_v37 = vmul.f32 %v2432_v31, %v1703_v25  ;;  %v1719_v1 = vmul.f32 %v2432_v31, %v1704_v26 }
 0x263   :  { %v1720_v38 = vmul.f32 %v2432_v31, %v1705_v28  ;;  %v1721_v6 = vmul.f32 %v2432_v31, %v1706_v27  ;;  %v1722_v40 = vmul.f32 %v2432_v31, %v1707_v32  ;;  %v1723_v20 = vmul.f32 %v2432_v31, %v1708_v30 }
 0x264   :  { %v1724_v42 = vmul.f32 %v2432_v31, %v1709_v34  ;;  %v1730_v23 = vmul.f32 %v1728_v18, %v1712_v33  ;;  %v1731_v43 = vmul.f32 %v1728_v18, %v1713_v39  ;;  %v1732_v29 = vmul.f32 %v1728_v18, %v1714_v46 }
 0x265   :  { %v1733_v44 = vmul.f32 %v1728_v18, %v1715_v57  ;;  %v1734_v35 = vmul.f32 %v1728_v18, %v1716_v36  ;;  %v1735_v45 = vmul.f32 %v1728_v18, %v1717_v60  ;;  %v1736_v47 = vmul.f32 %v1728_v18, %v1718_v37 }
 0x266   :  { %v1737_v49 = vmul.f32 %v1728_v18, %v1719_v1  ;;  %v1738_v50 = vmul.f32 %v1728_v18, %v1720_v38  ;;  %v1739_v51 = vmul.f32 %v1728_v18, %v1721_v6  ;;  %v1740_v52 = vmul.f32 %v1728_v18, %v1722_v40 }
 0x267   :  { %v1741_v53 = vmul.f32 %v1728_v18, %v1723_v20  ;;  %v1742_v54 = vmul.f32 %v1728_v18, %v1724_v42  ;;  %v1747_v55 = vadd.f32 %v1745_v41, %v1730_v23  ;;  %v1748_v56 = vadd.f32 %v1745_v41, %v1731_v43 }
 0x268   :  { %v1749_v58 = vadd.f32 %v1745_v41, %v1732_v29  ;;  %v1750_v59 = vadd.f32 %v1745_v41, %v1733_v44  ;;  %v1751_v61 = vadd.f32 %v1745_v41, %v1734_v35  ;;  %v1752_v62 = vadd.f32 %v1745_v41, %v1735_v45 }
 0x269   :  { %v1753_v63 = vadd.f32 %v1745_v41, %v1736_v47  ;;  %v1754_v0 = vadd.f32 %v1745_v41, %v1737_v49  ;;  %v1755_v2 = vadd.f32 %v1745_v41, %v1738_v50  ;;  %v1756_v3 = vadd.f32 %v1745_v41, %v1739_v51 }
 0x26a   :  { %v1757_v4 = vadd.f32 %v1745_v41, %v1740_v52  ;;  %v1758_v5 = vadd.f32 %v1745_v41, %v1741_v53  ;;  %v1759_v7 = vadd.f32 %v1745_v41, %v1742_v54  ;;  %v1760_v8 = vmax.f32 %v1747_v55, 0.0 }
 0x26b   :  { %v1761_v9 = vmax.f32 %v1748_v56, 0.0  ;;  %v1762_v10 = vmax.f32 %v1749_v58, 0.0  ;;  %v1763_v11 = vmax.f32 %v1750_v59, 0.0  ;;  %v1764_v12 = vmax.f32 %v1751_v61, 0.0 }
 0x26c   :  { %v1765_v13 = vmax.f32 %v1752_v62, 0.0  ;;  %v1766_v14 = vmax.f32 %v1753_v63, 0.0  ;;  %v1767_v15 = vmax.f32 %v1754_v0, 0.0  ;;  %v1768_v17 = vmax.f32 %v1755_v2, 0.0 }
 0x26d   :  { %v1769_v18 = vmax.f32 %v1756_v3, 0.0  ;;  %v1770_v48 = vmax.f32 %v1757_v4, 0.0  ;;  %v1771_v19 = vmax.f32 %v1758_v5, 0.0  ;;  %v1772_v21 = vmax.f32 %v1759_v7, 0.0 }
 0x26e   :  { %v2091_v22 = vpack.c.bf16 %v1761_v9, %v1760_v8  ;;  %v2092_v24 = vpack.c.bf16 %v1763_v11, %v1762_v10  ;;  %v2093_v25 = vpack.c.bf16 %v1765_v13, %v1764_v12  ;;  %v2094_v26 = vpack.c.bf16 %v1767_v15, %v1766_v14 }
 0x26f   :  { %v1785_v28 = vpack.c.bf16 %v1772_v21, %v1772_v21  ;;  %v2095_v31 = vpack.c.bf16 %v1769_v18, %v1768_v17  ;;  %v2096_v27 = vpack.c.bf16 %v1771_v19, %v1770_v48 }
 0x270   :  { %v1807_v32 = vrot.slane %v2091_v22, %v3212_v16  ;;  %v1814_v30 = vrot.slane %v2092_v24, %v3212_v16  ;;  %v1824_v34 = vrot.slane %v2093_v25, %v3212_v16  ;;  %v1831_v33 = vrot.slane %v2094_v26, %v3212_v16 }
 0x271   :  { %v1841_v39 = vrot.slane %v2095_v31, %v3212_v16  ;;  %v1848_v46 = vrot.slane %v2096_v27, %v3212_v16  ;;  %2097 = vst.sshfl [vmem:[%s3247_s3 + $0x18] sm:$0x3 pattern:$0x76325410] %v1785_v28 }
 0x272   :  { %v1815_v57 = vcombine.low %v1807_v32, %v1814_v30  ;;  %v1832_v36 = vcombine.low %v1824_v34, %v1831_v33 }
 0x273   :  { %v1849_v60 = vcombine.low %v1841_v39, %v1848_v46 }
 0x274   :  { %1861 = vst [vmem:[%s3247_s3] sm:$0xff] %v1815_v57  ;;  %1862 = vst [vmem:[%s3247_s3 + $0x8] sm:$0xff] %v1832_v36 }
 0x275   :  { %1863 = vst [vmem:[%s3247_s3 + $0x10] sm:$0xff] %v1849_v60 }

// kernel: student_net6_forward.3
= control target key start
LH: loop header
LB: loop body
LE: loop exit
PB: predicated region body
PF: predicated region fallthrough
CT: control target
= control target key end

     0   :  { %v550_v1 = vmov 0   ;;  %v551_v14 = vmov 1983009808   ;;  %v63_v16 = vlaneseq  ;;  %vm287_vm0 = vcmask 654336   ;;  %s708_s1 = inlined_call_operand.vmem [shape: bf16[336,256], index: 1, kind: input, shape index: {}]   ;;  %s709_s0 = inlined_call_operand.vmem [shape: bf16[4,336], index: 0, kind: input, shape index: {}]   ;;  %s710_s2 = inlined_call_operand.vmem [shape: f32[4,2], index: 2, kind: input, shape index: {}]   ;;  %s711_s3 = inlined_call_operand.vmem [shape: bf16[4,256], index: 3, kind: output, shape index: {}]  }
   0x1   :  { %v484_v0 = vld [vmem:[%s708_s1 + $0x4] ss:$8 sps:$4 sm:$0xff]   ;;  %364 = vmatprep.mubr.bf16.mxu0 %v550_v1  ;;  %481 = vset.pattern.permute.xlu1 %v550_v1  ;;  %v486_v2 = vld [vmem:[%s708_s1] ss:$8 sps:$4 sm:$0xff]   ;;  %v487_v3 = vld [vmem:[%s708_s1 + $0x14] ss:$8 sps:$4 sm:$0xff]   ;;  %v61_v15 = vunpack.c.l.s4 %v551_v14 }
   0x2   :  { %291 = vmatprep.subr.bf16.mxu1 %v484_v0  ;;  %v489_v4 = vld [vmem:[%s708_s1 + $0x10] ss:$8 sps:$4 sm:$0xff]   ;;  %v490_v5 = vld [vmem:[%s708_s1 + $0x24] ss:$8 sps:$4 sm:$0xff]   ;;  %v492_v6 = vld [vmem:[%s708_s1 + $0x20] ss:$8 sps:$4 sm:$0xff]  }
   0x3   :  { %292 = vmatpush1.bf16.msra.mxu1 %v486_v2  ;;  %v493_v7 = vld [vmem:[%s708_s1 + $0x34] ss:$8 sps:$4 sm:$0xff]   ;;  %v495_v8 = vld [vmem:[%s708_s1 + $0x30] ss:$8 sps:$4 sm:$0xff]   ;;  %v496_v9 = vld [vmem:[%s708_s1 + $0x44] ss:$8 sps:$4 sm:$0xff]   ;;  %v62_v22 = vunpack.c.0.s8 %v61_v15 }
   0x4   :  { %293 = vmatprep.subr.bf16.mxu1 %v487_v3  ;;  %v498_v10 = vld [vmem:[%s708_s1 + $0x40] ss:$8 sps:$4 sm:$0xff]   ;;  %v517_v11 = vld [vmem:[%s708_s1 + $0x104] ss:$8 sps:$4 sm:$0xff]   ;;  %v499_v13 = vld [vmem:[%s708_s1 + $0x54] ss:$8 sps:$4 sm:$0xff]  }
   0x5   :  { %v519_v12 = vld [vmem:[%s708_s1 + $0x100] ss:$8 sps:$4 sm:$0xff]   ;;  %332 = vmatprep.subr.bf16.mxu0 %v517_v11  ;;  %v523_v17 = vld [vmem:[%s708_s1 + $0x114] ss:$8 sps:$4 sm:$0xff]   ;;  %v525_v18 = vld [vmem:[%s708_s1 + $0x110] ss:$8 sps:$4 sm:$0xff]  }
   0x6   :  { %333 = vmatpush1.bf16.msra.mxu0 %v519_v12  ;;  %v501_v19 = vld [vmem:[%s708_s1 + $0x50] ss:$8 sps:$4 sm:$0xff]   ;;  %v502_v20 = vld [vmem:[%s708_s1 + $0x64] ss:$8 sps:$4 sm:$0xff]   ;;  %v64_v23 = vshrl.u32 %v63_v16, 7  ;;  %v552_v55 = vmov 1  }
   0x7   :  { %294 = vmatpush1.bf16.msra.mxu1 %v489_v4  ;;  %334 = vmatprep.subr.bf16.mxu0 %v523_v17  ;;  %v529_v21 = vld [vmem:[%s708_s1 + $0x124] ss:$8 sps:$4 sm:$0xff]   ;;  %v531_v24 = vld [vmem:[%s708_s1 + $0x120] ss:$8 sps:$4 sm:$0xff]   ;;  %v535_v26 = vld [vmem:[%s708_s1 + $0x134] ss:$8 sps:$4 sm:$0xff]  }
   0x8   :  { %295 = vmatprep.subr.bf16.mxu1 %v490_v5  ;;  %v504_v25 = vld [vmem:[%s708_s1 + $0x60] ss:$8 sps:$4 sm:$0xff]   ;;  %v505_v27 = vld [vmem:[%s708_s1 + $0x74] ss:$8 sps:$4 sm:$0xff]   ;;  %v65_v28 = vsub.s32 %v62_v22, %v64_v23  ;;  %v537_v29 = vld [vmem:[%s708_s1 + $0x130] ss:$8 sps:$4 sm:$0xff]   ;;  %483 = vset.pattern.permute.xlu0 %v552_v55 }
   0x9   :  { %v507_v30 = vld [vmem:[%s708_s1 + $0x70] ss:$8 sps:$4 sm:$0xff]   ;;  %v541_v31 = vld [vmem:[%s708_s1 + $0x144] ss:$8 sps:$4 sm:$0xff]   ;;  %v543_v36 = vld [vmem:[%s708_s1 + $0x140] ss:$8 sps:$4 sm:$0xff]  }
   0xa   :  { %335 = vmatpush1.bf16.msra.mxu0 %v525_v18  ;;  %v508_v32 = vld [vmem:[%s708_s1 + $0x84] ss:$8 sps:$4 sm:$0xff]   ;;  %v510_v37 = vld [vmem:[%s708_s1 + $0x80] ss:$8 sps:$4 sm:$0xff]   ;;  %v511_v39 = vld [vmem:[%s708_s1 + $0x94] ss:$8 sps:$4 sm:$0xff]  }
   0xb   :  { %296 = vmatpush1.bf16.msra.mxu1 %v492_v6  ;;  %336 = vmatprep.subr.bf16.mxu0 %v529_v21  ;;  %v15_v33 = vld [vmem:[%s709_s0] sm:$0x3f]  ;;  %v513_v41 = vld [vmem:[%s708_s1 + $0x90] ss:$8 sps:$4 sm:$0xff]   ;;  %v520_v44 = vld [vmem:[%s708_s1 + $0xb4] ss:$8 sps:$4 sm:$0xff]  }
   0xc   :  { %297 = vmatprep.subr.bf16.mxu1 %v493_v7  ;;  %v59_v34 = vcombine.high %v15_v33, %v15_v33  ;;  %v66_v35 = vrot.slane %v15_v33, %v65_v28  ;;  %v514_v42 = vld [vmem:[%s708_s1 + $0xa4] ss:$8 sps:$4 sm:$0xff]   ;;  %v516_v43 = vld [vmem:[%s708_s1 + $0xa0] ss:$8 sps:$4 sm:$0xff]   ;;  %v522_v45 = vld [vmem:[%s708_s1 + $0xb0] ss:$8 sps:$4 sm:$0xff]  }
   0xd   :  { %v526_v46 = vld [vmem:[%s708_s1 + $0xc4] ss:$8 sps:$4 sm:$0xff]   ;;  %v528_v47 = vld [vmem:[%s708_s1 + $0xc0] ss:$8 sps:$4 sm:$0xff]   ;;  %v532_v48 = vld [vmem:[%s708_s1 + $0xd4] ss:$8 sps:$4 sm:$0xff]  }
   0xe   :  { %337 = vmatpush1.bf16.msra.mxu0 %v531_v24  ;;  %v74_v38 = vcombine.high %v66_v35, %v66_v35  ;;  %v73_v40 = vrot.slane %v59_v34, %v65_v28  ;;  %v534_v49 = vld [vmem:[%s708_s1 + $0xd0] ss:$8 sps:$4 sm:$0xff]   ;;  %v538_v50 = vld [vmem:[%s708_s1 + $0xe4] ss:$8 sps:$4 sm:$0xff]   ;;  %v540_v51 = vld [vmem:[%s708_s1 + $0xe0] ss:$8 sps:$4 sm:$0xff]  }
   0xf   :  { %298 = vmatpush1.bf16.msra.mxu1 %v495_v8  ;;  %338 = vmatprep.subr.bf16.mxu0 %v535_v26  ;;  %v544_v52 = vld [vmem:[%s708_s1 + $0xf4] ss:$8 sps:$4 sm:$0xff]   ;;  %v546_v53 = vld [vmem:[%s708_s1 + $0xf0] ss:$8 sps:$4 sm:$0xff]   ;;  %v391_v54 = vld [vmem:[%s710_s2] sm:$0xf] }
  0x10   :  { %299 = vmatprep.subr.bf16.mxu1 %v496_v9  ;;  %323 = vmatprep.mubr.bf16.mxu1 %v74_v38  ;;  %vm373_vm1 = vcmask 1043456  }
  0x11   :  { %400 = vperm.xlu1 %481, %v391_v54  }
  0x12   :  { %339 = vmatpush1.bf16.msra.mxu0 %v537_v29 }
  0x13   :  { %300 = vmatpush1.bf16.msra.mxu1 %v498_v10  ;;  %340 = vmatprep.subr.bf16.mxu0 %v541_v31 }
  0x14   :  { %301 = vmatprep.subr.bf16.mxu1 %v499_v13 }
  0x15   :  { %482 = vset.pattern.permute.xlu1 %v552_v55 }
  0x16   :  { %341 = vmatpush1.bf16.msra.mxu0 %v543_v36  ;;  %406 = vperm.xlu1 %482, %v391_v54  }
  0x17   :  { %302 = vmatpush1.bf16.msra.mxu1 %v501_v19 }
  0x18   :  { %303 = vmatprep.subr.bf16.mxu1 %v502_v20 }
  0x19   :  { %473 = vmatmul.mubr.msk.bf16.vlgmr.msra.gmra.mrb[0].mxu0 %vm287_vm0, %v73_v40 }
  0x1b   :  { %304 = vmatpush1.bf16.msra.mxu1 %v504_v25 }
  0x1c   :  { %305 = vmatprep.subr.bf16.mxu1 %v505_v27 }
  0x1f   :  { %306 = vmatpush1.bf16.msra.mxu1 %v507_v30 }
  0x20   :  { %307 = vmatprep.subr.bf16.mxu1 %v508_v32 }
  0x23   :  { %308 = vmatpush1.bf16.msra.mxu1 %v510_v37 }
  0x24   :  { %309 = vmatprep.subr.bf16.mxu1 %v511_v39 }
  0x27   :  { %310 = vmatpush1.bf16.msra.mxu1 %v513_v41 }
  0x28   :  { %311 = vmatprep.subr.bf16.mxu1 %v514_v42 }
  0x2b   :  { %312 = vmatpush1.bf16.msra.mxu1 %v516_v43 }
  0x2c   :  { %313 = vmatprep.subr.bf16.mxu1 %v520_v44 }
  0x2f   :  { %314 = vmatpush1.bf16.msra.mxu1 %v522_v45 }
  0x30   :  { %315 = vmatprep.subr.bf16.mxu1 %v526_v46 }
  0x33   :  { %316 = vmatpush1.bf16.msra.mxu1 %v528_v47 }
  0x34   :  { %317 = vmatprep.subr.bf16.mxu1 %v532_v48 }
  0x37   :  { %318 = vmatpush1.bf16.msra.mxu1 %v534_v49 }
  0x38   :  { %319 = vmatprep.subr.bf16.mxu1 %v538_v50 }
  0x3b   :  { %320 = vmatpush1.bf16.msra.mxu1 %v540_v51 }
  0x3c   :  { %321 = vmatprep.subr.bf16.mxu1 %v544_v52 }
  0x3f   :  { %322 = vmatpush1.bf16.msra.mxu1 %v546_v53 }
  0x42   :  { %324 = vmatmul.mubr.bf16.vlgmr.msra.gmra.mrb[0].mxu1 %v66_v35 }
  0x90   :  { %v401_v18 = vpop.permute.xlu1 %400 }
  0x95   :  { %v407_v24 = vpop.permute.xlu1 %406 }
  0xec   :  { %v366_v56 = vpop.f32.mrb[0].mxu0 }
  0xed   :  { %v368_v57 = vpop.f32.mrb[1].mxu0 }
  0xee   :  { %v370_v58 = vpop.f32.mrb[2].mxu0 }
  0xef   :  { %v371_v59 = vpop.f32.mrb[3].mxu0 }
 0x115   :  { %v325_v60 = vpop.f32.mrb[0].mxu1 }
 0x116   :  { %v367_v61 = vadd.f32 %v366_v56, %v325_v60  ;;  %v327_v62 = vpop.f32.mrb[1].mxu1 }
 0x117   :  { %v369_v63 = vadd.f32 %v368_v57, %v327_v62  ;;  %v329_v0 = vpop.f32.mrb[2].mxu1 }
 0x118   :  { %v330_v1 = vpop.f32.mrb[3].mxu1  ;;  %v374_v2 = vsel %vm373_vm1, %v367_v61, 0.0  ;;  %v380_v3 = vmul.f32 %v367_v61, %v367_v61 }
 0x119   :  { %v375_v4 = vsel %vm373_vm1, %v369_v63, 0.0  ;;  %v381_v5 = vmul.f32 %v369_v63, %v369_v63 }
 0x11a   :  { %v376_v6 = vadd.f32 %v375_v4, %v374_v2  ;;  %v382_v7 = vsel %vm373_vm1, %v380_v3, 0.0 }
 0x11b   :  { %v383_v8 = vsel %vm373_vm1, %v381_v5, 0.0 }
 0x11c   :  { %377 = vadd.xlane.f32.xlu0 %v376_v6  ;;  %v384_v9 = vadd.f32 %v383_v8, %v382_v7 }
 0x120   :  { %385 = vadd.xlane.f32.xlu0 %v384_v9 }
 0x1a9   :  { %v378_v10 = vpop.xlane.xlu0 %377 }
 0x1aa   :  { %v379_v11 = vmul.f32 0.005, %v378_v10 }
 0x1ac   :  { %v388_v13 = vmul.f32 %v379_v11, %v379_v11  ;;  %v392_v19 = vsub.f32 %v367_v61, %v379_v11  ;;  %v393_v20 = vsub.f32 %v369_v63, %v379_v11 }
 0x1ad   :  { %v386_v12 = vpop.xlane.xlu0 %385 }
 0x1ae   :  { %v387_v14 = vmul.f32 0.005, %v386_v12 }
 0x1b0   :  { %v389_v15 = vsub.f32 %v387_v14, %v388_v13 }
 0x1b2   :  { %v390_v16 = vmax.f32 %v389_v15, 0.0 }
 0x1b4   :  { %v394_v17 = vadd.f32 1e-05, %v390_v16 }
 0x1b6   :  { %548 = vrsqrt.f32 %v394_v17 }
 0x1c0   :  { %v549_v21 = vpop.eup %548 }
 0x1c1   :  { %v396_v22 = vmul.f32 %v549_v21, %v392_v19  ;;  %v397_v23 = vmul.f32 %v549_v21, %v393_v20 }
 0x1c3   :  { %v403_v25 = vmul.f32 %v401_v18, %v396_v22  ;;  %v404_v26 = vmul.f32 %v401_v18, %v397_v23 }
 0x1c5   :  { %v409_v27 = vadd.f32 %v407_v24, %v403_v25  ;;  %v410_v28 = vadd.f32 %v407_v24, %v404_v26 }
 0x1c7   :  { %v411_v29 = vmax.f32 %v409_v27, 0.0  ;;  %v412_v30 = vmax.f32 %v410_v28, 0.0 }
 0x1c9   :  { %v474_v31 = vpack.c.bf16 %v412_v30, %v411_v29 }
 0x1cb   :  { %475 = vst.sshfl [vmem:[%s711_s3] sm:$0x33 pattern:$0x76325410] %v474_v31 }

</bundles_post_ra>
